<compile_context>
chip_gen: v7x
topology: tpu7x:2x2x1
jax: 0.10.0
libtpu: 0.0.40
codegen_flags: <defaults>
</compile_context>

<pallas_src>
import functools

import jax
import jax.numpy as jnp
from jax.experimental import pallas as pl
from jax.experimental.pallas import tpu as pltpu

IN_DIM = 3 * 32 * 32   # 3072
HID = 256
OUT_DIM = 10
OUT_PAD = 128          # lane-dense padded class dimension


def _round_up(n, m):
    return ((n + m - 1) // m) * m


def mlp_kernel(x_ref, w1_ref, b1_ref, w2_ref, b2_ref, w3_ref, b3_ref, out_ref):
    # x tile: (TM, 3072) bf16; weights bf16 resident; biases f32.
    x = x_ref[...]

    h1 = jnp.dot(x, w1_ref[...], preferred_element_type=jnp.float32) + b1_ref[...]
    h1 = jnp.maximum(h1, 0.0)

    h2 = jnp.dot(h1.astype(jnp.bfloat16), w2_ref[...],
                 preferred_element_type=jnp.float32) + b2_ref[...]
    h2 = jnp.maximum(h2, 0.0)

    logits = jnp.dot(h2.astype(jnp.bfloat16), w3_ref[...],
                     preferred_element_type=jnp.float32) + b3_ref[...]

    # Mask the padded class columns (>= OUT_DIM) so they contribute nothing
    # to the softmax normalization.
    col = jax.lax.broadcasted_iota(jnp.int32, logits.shape, 1)
    logits = jnp.where(col < OUT_DIM, logits, jnp.float32(-1e30))

    # Numerically stable log_softmax over the (padded) class axis, in f32.
    m = jnp.max(logits, axis=-1, keepdims=True)
    shifted = logits - m
    lse = jnp.log(jnp.sum(jnp.exp(shifted), axis=-1, keepdims=True))
    out_ref[...] = shifted - lse


@functools.partial(jax.jit, static_argnames=("tm",))
def mlpnet_forward(x_nchw, params, tm=256):
    """x_nchw: (B, 3, 32, 32) float32. Returns (B, 10) log-probabilities."""
    b = x_nchw.shape[0]
    # Row-major flatten == torch's x.view(x.size(0), -1) on NCHW input.
    x_flat = x_nchw.reshape(b, -1).astype(jnp.float32)

    w1, b1, w2, b2, w3, b3 = params

    # Batch tile: multiple of 16 (bf16 sublane packing), capped at `tm`
    # (256 is a multiple of both the v5e 128-wide and v6e/v7x 256-wide MXU).
    tm_eff = min(tm, _round_up(b, 16))
    b_pad = _round_up(b, tm_eff)
    if b_pad != b:
        x_flat = jnp.pad(x_flat, ((0, b_pad - b), (0, 0)))

    # bf16 MXU operands; biases stay f32 (elementwise path stays f32).
    x_bf = x_flat.astype(jnp.bfloat16)
    w1_bf = w1.astype(jnp.bfloat16)
    w2_bf = w2.astype(jnp.bfloat16)
    w3_bf = jnp.pad(w3, ((0, 0), (0, OUT_PAD - OUT_DIM))).astype(jnp.bfloat16)
    b3_p = jnp.pad(b3, ((0, 0), (0, OUT_PAD - OUT_DIM))).astype(jnp.float32)

    grid = (b_pad // tm_eff,)

    def resident(shape):
        # Constant index_map -> block stays resident in VMEM across the grid.
        return pl.BlockSpec(shape, lambda i: (0, 0))

    out_pad = pl.pallas_call(
        mlp_kernel,
        out_shape=jax.ShapeDtypeStruct((b_pad, OUT_PAD), jnp.float32),
        grid=grid,
        in_specs=[
            pl.BlockSpec((tm_eff, IN_DIM), lambda i: (i, 0)),  # x (pipelined)
            resident((IN_DIM, HID)),                           # w1
            resident((1, HID)),                                # b1
            resident((HID, HID)),                              # w2
            resident((1, HID)),                                # b2
            resident((HID, OUT_PAD)),                          # w3 (padded)
            resident((1, OUT_PAD)),                            # b3 (padded)
        ],
        out_specs=pl.BlockSpec((tm_eff, OUT_PAD), lambda i: (i, 0)),
        compiler_params=pltpu.CompilerParams(
            dimension_semantics=("parallel",),      # shard batch over v7x's 2 TCs
            vmem_limit_bytes=48 * 1024 * 1024,      # well under v7x's 64 MiB physical
        ),
    )(x_bf, w1_bf, b1, w2_bf, b2, w3_bf, b3_p)

    # Drop batch padding and the padded class columns.
    return out_pad[:b, :OUT_DIM]


def init_params(key):
    """Deterministic init mimicking nn.Linear's U(-1/sqrt(fan_in), 1/sqrt(fan_in)).
    Weights stored transposed: (in_features, out_features)."""
    ks = jax.random.split(key, 6)

    def linear(kw, kb, fan_in, fan_out):
        bound = 1.0 / jnp.sqrt(fan_in)
        w = jax.random.uniform(kw, (fan_in, fan_out), jnp.float32, -bound, bound)
        bias = jax.random.uniform(kb, (1, fan_out), jnp.float32, -bound, bound)
        return w, bias

    w1, b1 = linear(ks[0], ks[1], IN_DIM, HID)
    w2, b2 = linear(ks[2], ks[3], HID, HID)
    w3, b3 = linear(ks[4], ks[5], HID, OUT_DIM)
    return (w1, b1, w2, b2, w3, b3)


def _ref_forward(x_nchw, params):
    """Pure-JAX f32 reference of the PyTorch forward."""
    w1, b1, w2, b2, w3, b3 = params
    xf = x_nchw.reshape(x_nchw.shape[0], -1)
    h1 = jnp.maximum(xf @ w1 + b1, 0.0)
    h2 = jnp.maximum(h1 @ w2 + b2, 0.0)
    logits = h2 @ w3 + b3
    return jax.nn.log_softmax(logits, axis=-1)


if __name__ == "__main__":
    key = jax.random.PRNGKey(0)
    k_x, k_p = jax.random.split(key)

    # Small CIFAR-10-shaped NCHW batch, as fc1's 3*32*32 input implies.
    x = jax.random.normal(k_x, (2, 3, 32, 32), jnp.float32)
    params = init_params(k_p)

    out = mlpnet_forward(x, params)
    out = jax.block_until_ready(out)

    assert out.shape == (2, 10)
    # log_softmax sanity: rows exp-sum to 1.
    row_sums = jnp.sum(jnp.exp(out), axis=-1)
    assert bool(jnp.all(jnp.abs(row_sums - 1.0) < 1e-4))
    # Agreement with the f32 pure-JAX reference (loose tol: bf16 MXU inputs).
    ref = _ref_forward(x, params)
    assert bool(jnp.max(jnp.abs(out - ref)) < 1e-1)

    print("KERNEL_OK")
</pallas_src>

<mosaic_0001>
module attributes {stable_mosaic.version = 11 : i64} {
  func.func @mlp_kernel(%arg0: i32, %arg1: memref<16x3072xbf16, #tpu.memory_space<vmem>>, %arg2: memref<3072x256xbf16, #tpu.memory_space<vmem>>, %arg3: memref<1x256xf32, #tpu.memory_space<vmem>>, %arg4: memref<256x256xbf16, #tpu.memory_space<vmem>>, %arg5: memref<1x256xf32, #tpu.memory_space<vmem>>, %arg6: memref<256x128xbf16, #tpu.memory_space<vmem>>, %arg7: memref<1x128xf32, #tpu.memory_space<vmem>>, %arg8: memref<16x128xf32, #tpu.memory_space<vmem>>) attributes {dimension_semantics = [#tpu.dimension_semantics<parallel>], iteration_bounds = array<i64: 1>, scalar_prefetch = 0 : i64, scratch_operands = 0 : i64, tpu.core_type = #tpu.core_type<tc>, window_params = [{transform_indices = @transform_0, window_bounds = array<i64: 16, 3072>}, {pipeline_mode = #tpu.pipeline_mode<synchronous>, transform_indices = @transform_1, window_bounds = array<i64: 3072, 256>}, {pipeline_mode = #tpu.pipeline_mode<synchronous>, transform_indices = @transform_2, window_bounds = array<i64: 1, 256>}, {pipeline_mode = #tpu.pipeline_mode<synchronous>, transform_indices = @transform_3, window_bounds = array<i64: 256, 256>}, {pipeline_mode = #tpu.pipeline_mode<synchronous>, transform_indices = @transform_4, window_bounds = array<i64: 1, 256>}, {pipeline_mode = #tpu.pipeline_mode<synchronous>, transform_indices = @transform_5, window_bounds = array<i64: 256, 128>}, {pipeline_mode = #tpu.pipeline_mode<synchronous>, transform_indices = @transform_6, window_bounds = array<i64: 1, 128>}, {transform_indices = @transform_7, window_bounds = array<i64: 16, 128>}]} {
    %c0 = arith.constant 0 : index
    %c0_0 = arith.constant 0 : index
    %0 = vector.load %arg1[%c0, %c0_0] : memref<16x3072xbf16, #tpu.memory_space<vmem>>, vector<16x3072xbf16>
    %c0_1 = arith.constant 0 : index
    %c0_2 = arith.constant 0 : index
    %1 = vector.load %arg2[%c0_1, %c0_2] : memref<3072x256xbf16, #tpu.memory_space<vmem>>, vector<3072x256xbf16>
    %cst = arith.constant dense<0.000000e+00> : vector<16x256xf32>
    %2 = tpu.matmul %0, %1, %cst {dimension_numbers = #tpu.dot_dimension_numbers<[1], [0], [0], [1], [0, 0, 1, 1], [], []>} : vector<16x3072xbf16>, vector<3072x256xbf16>, vector<16x256xf32> -> vector<16x256xf32>
    %c0_3 = arith.constant 0 : index
    %c0_4 = arith.constant 0 : index
    %3 = vector.load %arg3[%c0_3, %c0_4] : memref<1x256xf32, #tpu.memory_space<vmem>>, vector<1x256xf32>
    %4 = vector.broadcast %3 : vector<1x256xf32> to vector<16x256xf32>
    %5 = arith.addf %2, %4 : vector<16x256xf32>
    %cst_5 = arith.constant 0.000000e+00 : f32
    %6 = vector.broadcast %cst_5 : f32 to vector<16x256xf32>
    %7 = arith.maximumf %5, %6 : vector<16x256xf32>
    %8 = arith.truncf %7 : vector<16x256xf32> to vector<16x256xbf16>
    %c0_6 = arith.constant 0 : index
    %c0_7 = arith.constant 0 : index
    %9 = vector.load %arg4[%c0_6, %c0_7] : memref<256x256xbf16, #tpu.memory_space<vmem>>, vector<256x256xbf16>
    %cst_8 = arith.constant dense<0.000000e+00> : vector<16x256xf32>
    %10 = tpu.matmul %8, %9, %cst_8 {dimension_numbers = #tpu.dot_dimension_numbers<[1], [0], [0], [1], [0, 0, 1, 1], [], []>} : vector<16x256xbf16>, vector<256x256xbf16>, vector<16x256xf32> -> vector<16x256xf32>
    %c0_9 = arith.constant 0 : index
    %c0_10 = arith.constant 0 : index
    %11 = vector.load %arg5[%c0_9, %c0_10] : memref<1x256xf32, #tpu.memory_space<vmem>>, vector<1x256xf32>
    %12 = vector.broadcast %11 : vector<1x256xf32> to vector<16x256xf32>
    %13 = arith.addf %10, %12 : vector<16x256xf32>
    %cst_11 = arith.constant 0.000000e+00 : f32
    %14 = vector.broadcast %cst_11 : f32 to vector<16x256xf32>
    %15 = arith.maximumf %13, %14 : vector<16x256xf32>
    %16 = arith.truncf %15 : vector<16x256xf32> to vector<16x256xbf16>
    %c0_12 = arith.constant 0 : index
    %c0_13 = arith.constant 0 : index
    %17 = vector.load %arg6[%c0_12, %c0_13] : memref<256x128xbf16, #tpu.memory_space<vmem>>, vector<256x128xbf16>
    %cst_14 = arith.constant dense<0.000000e+00> : vector<16x128xf32>
    %18 = tpu.matmul %16, %17, %cst_14 {dimension_numbers = #tpu.dot_dimension_numbers<[1], [0], [0], [1], [0, 0, 1, 1], [], []>} : vector<16x256xbf16>, vector<256x128xbf16>, vector<16x128xf32> -> vector<16x128xf32>
    %c0_15 = arith.constant 0 : index
    %c0_16 = arith.constant 0 : index
    %19 = vector.load %arg7[%c0_15, %c0_16] : memref<1x128xf32, #tpu.memory_space<vmem>>, vector<1x128xf32>
    %20 = vector.broadcast %19 : vector<1x128xf32> to vector<16x128xf32>
    %21 = arith.addf %18, %20 : vector<16x128xf32>
    %22 = tpu.iota {dimensions = array<i32: 1>} : vector<16x128xi32>
    %c10_i32 = arith.constant 10 : i32
    %23 = vector.broadcast %c10_i32 : i32 to vector<16x128xi32>
    %24 = arith.cmpi slt, %22, %23 : vector<16x128xi32>
    %cst_17 = arith.constant -1.000000e+30 : f32
    %25 = vector.broadcast %cst_17 : f32 to vector<16x128xf32>
    %26 = arith.select %24, %21, %25 : vector<16x128xi1>, vector<16x128xf32>
    %cst_18 = arith.constant dense<0xFF800000> : vector<16xf32>
    %27 = vector.multi_reduction <maximumf>, %26, %cst_18 [1] : vector<16x128xf32> to vector<16xf32>
    %28 = vector.shape_cast %27 : vector<16xf32> to vector<16x1xf32>
    %29 = vector.broadcast %28 : vector<16x1xf32> to vector<16x128xf32>
    %30 = arith.subf %26, %29 : vector<16x128xf32>
    %31 = math.exp %30 : vector<16x128xf32>
    %cst_19 = arith.constant dense<0.000000e+00> : vector<16xf32>
    %32 = vector.multi_reduction <add>, %31, %cst_19 [1] : vector<16x128xf32> to vector<16xf32>
    %33 = vector.shape_cast %32 : vector<16xf32> to vector<16x1xf32>
    %34 = math.log %33 : vector<16x1xf32>
    %35 = vector.broadcast %34 : vector<16x1xf32> to vector<16x128xf32>
    %36 = arith.subf %30, %35 : vector<16x128xf32>
    %c0_20 = arith.constant 0 : index
    %c0_21 = arith.constant 0 : index
    %37 = vector.load %arg8[%c0_20, %c0_21] : memref<16x128xf32, #tpu.memory_space<vmem>>, vector<16x128xf32>
    tpu.vector_store %arg8[%c0_20, %c0_21], %36 {strides = array<i32>} : memref<16x128xf32, #tpu.memory_space<vmem>>, vector<16x128xf32>,
    return
  }
  func.func @transform_0(%arg0: i32) -> (i32, i32) {
    %c0_i32 = arith.constant 0 : i32
    %c0_i32_0 = arith.constant 0 : i32
    return %arg0, %c0_i32 : i32, i32
  }
  func.func @transform_1(%arg0: i32) -> (i32, i32) {
    %c0_i32 = arith.constant 0 : i32
    %c0_i32_0 = arith.constant 0 : i32
    %c0_i32_1 = arith.constant 0 : i32
    return %c0_i32, %c0_i32_0 : i32, i32
  }
  func.func @transform_2(%arg0: i32) -> (i32, i32) {
    %c0_i32 = arith.constant 0 : i32
    %c0_i32_0 = arith.constant 0 : i32
    %c0_i32_1 = arith.constant 0 : i32
    return %c0_i32, %c0_i32_0 : i32, i32
  }
  func.func @transform_3(%arg0: i32) -> (i32, i32) {
    %c0_i32 = arith.constant 0 : i32
    %c0_i32_0 = arith.constant 0 : i32
    %c0_i32_1 = arith.constant 0 : i32
    return %c0_i32, %c0_i32_0 : i32, i32
  }
  func.func @transform_4(%arg0: i32) -> (i32, i32) {
    %c0_i32 = arith.constant 0 : i32
    %c0_i32_0 = arith.constant 0 : i32
    %c0_i32_1 = arith.constant 0 : i32
    return %c0_i32, %c0_i32_0 : i32, i32
  }
  func.func @transform_5(%arg0: i32) -> (i32, i32) {
    %c0_i32 = arith.constant 0 : i32
    %c0_i32_0 = arith.constant 0 : i32
    %c0_i32_1 = arith.constant 0 : i32
    return %c0_i32, %c0_i32_0 : i32, i32
  }
  func.func @transform_6(%arg0: i32) -> (i32, i32) {
    %c0_i32 = arith.constant 0 : i32
    %c0_i32_0 = arith.constant 0 : i32
    %c0_i32_1 = arith.constant 0 : i32
    return %c0_i32, %c0_i32_0 : i32, i32
  }
  func.func @transform_7(%arg0: i32) -> (i32, i32) {
    %c0_i32 = arith.constant 0 : i32
    %c0_i32_0 = arith.constant 0 : i32
    return %arg0, %c0_i32 : i32, i32
  }
}

</mosaic_0001>

<bundles_post_ra>
// kernel: mlpnet_forward.1
= control target key start
LH: loop header
LB: loop body
LE: loop exit
PB: predicated region body
PF: predicated region fallthrough
CT: control target
= control target key end

     0   :  { %s6149_s1 = inlined_call_operand.vmem [shape: bf16[3072,256], index: 1, kind: input, shape index: {}]   ;;  %s6150_s0 = inlined_call_operand.vmem [shape: bf16[16,3072], index: 0, kind: input, shape index: {}]   ;;  %s6151_s3 = inlined_call_operand.vmem [shape: bf16[256,256], index: 3, kind: input, shape index: {}]   ;;  %s6152_s5 = inlined_call_operand.vmem [shape: bf16[256,128], index: 5, kind: input, shape index: {}]   ;;  %s6153_s2 = inlined_call_operand.vmem [shape: f32[1,256], index: 2, kind: input, shape index: {}]   ;;  %s6154_s4 = inlined_call_operand.vmem [shape: f32[1,256], index: 4, kind: input, shape index: {}]   ;;  %s6155_s6 = inlined_call_operand.vmem [shape: f32[1,128], index: 6, kind: input, shape index: {}]   ;;  %s6156_s7 = inlined_call_operand.vmem [shape: f32[16,128], index: 7, kind: output, shape index: {}]  }
   0x1   :  { %v3996_v0 = vld [vmem:[%s6149_s1 + $0x4] ss:$8 sps:$4 sm:$0xff]   ;;  %v4000_v2 = vld [vmem:[%s6149_s1] ss:$8 sps:$4 sm:$0xff]   ;;  %v4002_v4 = vld [vmem:[%s6149_s1 + $0x14] ss:$8 sps:$4 sm:$0xff]  }
   0x2   :  { %v3998_v1 = vld [vmem:[%s6149_s1 + $0x504] ss:$8 sps:$4 sm:$0xff]   ;;  %2487 = vmatprep.subr.bf16.mxu1 %v3996_v0  ;;  %v4001_v3 = vld [vmem:[%s6149_s1 + $0x500] ss:$8 sps:$4 sm:$0xff]   ;;  %v4004_v5 = vld [vmem:[%s6149_s1 + $0x514] ss:$8 sps:$4 sm:$0xff]  }
   0x3   :  { %2702 = vmatprep.subr.bf16.mxu0 %v3998_v1  ;;  %2488 = vmatpush1.bf16.msra.mxu1 %v4000_v2  ;;  %v4006_v6 = vld [vmem:[%s6149_s1 + $0x10] ss:$8 sps:$4 sm:$0xff]   ;;  %v4008_v8 = vld [vmem:[%s6149_s1 + $0x24] ss:$8 sps:$4 sm:$0xff]   ;;  %v4012_v10 = vld [vmem:[%s6149_s1 + $0x20] ss:$8 sps:$4 sm:$0xff]  }
   0x4   :  { %2703 = vmatpush1.bf16.msra.mxu0 %v4001_v3  ;;  %2489 = vmatprep.subr.bf16.mxu1 %v4002_v4  ;;  %v4007_v7 = vld [vmem:[%s6149_s1 + $0x510] ss:$8 sps:$4 sm:$0xff]   ;;  %v4010_v9 = vld [vmem:[%s6149_s1 + $0x524] ss:$8 sps:$4 sm:$0xff]   ;;  %v4013_v11 = vld [vmem:[%s6149_s1 + $0x520] ss:$8 sps:$4 sm:$0xff]  }
   0x5   :  { %2704 = vmatprep.subr.bf16.mxu0 %v4004_v5  ;;  %v4014_v12 = vld [vmem:[%s6149_s1 + $0x34] ss:$8 sps:$4 sm:$0xff]   ;;  %v4018_v14 = vld [vmem:[%s6149_s1 + $0x30] ss:$8 sps:$4 sm:$0xff]   ;;  %v4020_v16 = vld [vmem:[%s6149_s1 + $0x44] ss:$8 sps:$4 sm:$0xff]  }
   0x6   :  { %v4016_v13 = vld [vmem:[%s6149_s1 + $0x534] ss:$8 sps:$4 sm:$0xff]   ;;  %v4019_v15 = vld [vmem:[%s6149_s1 + $0x530] ss:$8 sps:$4 sm:$0xff]   ;;  %v4022_v17 = vld [vmem:[%s6149_s1 + $0x544] ss:$8 sps:$4 sm:$0xff]  }
   0x7   :  { %2490 = vmatpush1.bf16.msra.mxu1 %v4006_v6  ;;  %v4024_v18 = vld [vmem:[%s6149_s1 + $0x40] ss:$8 sps:$4 sm:$0xff]   ;;  %v4026_v20 = vld [vmem:[%s6149_s1 + $0x54] ss:$8 sps:$4 sm:$0xff]   ;;  %v4030_v22 = vld [vmem:[%s6149_s1 + $0x50] ss:$8 sps:$4 sm:$0xff]  }
   0x8   :  { %2705 = vmatpush1.bf16.msra.mxu0 %v4007_v7  ;;  %2491 = vmatprep.subr.bf16.mxu1 %v4008_v8  ;;  %v4025_v19 = vld [vmem:[%s6149_s1 + $0x540] ss:$8 sps:$4 sm:$0xff]   ;;  %v4028_v21 = vld [vmem:[%s6149_s1 + $0x554] ss:$8 sps:$4 sm:$0xff]   ;;  %v4031_v23 = vld [vmem:[%s6149_s1 + $0x550] ss:$8 sps:$4 sm:$0xff]  }
   0x9   :  { %2706 = vmatprep.subr.bf16.mxu0 %v4010_v9  ;;  %v4032_v24 = vld [vmem:[%s6149_s1 + $0x64] ss:$8 sps:$4 sm:$0xff]   ;;  %v4036_v26 = vld [vmem:[%s6149_s1 + $0x60] ss:$8 sps:$4 sm:$0xff]   ;;  %v4038_v28 = vld [vmem:[%s6149_s1 + $0x74] ss:$8 sps:$4 sm:$0xff]  }
   0xa   :  { %v4034_v25 = vld [vmem:[%s6149_s1 + $0x564] ss:$8 sps:$4 sm:$0xff]   ;;  %v4037_v27 = vld [vmem:[%s6149_s1 + $0x560] ss:$8 sps:$4 sm:$0xff]   ;;  %v4040_v29 = vld [vmem:[%s6149_s1 + $0x574] ss:$8 sps:$4 sm:$0xff]  }
   0xb   :  { %2492 = vmatpush1.bf16.msra.mxu1 %v4012_v10  ;;  %v4042_v30 = vld [vmem:[%s6149_s1 + $0x70] ss:$8 sps:$4 sm:$0xff]   ;;  %v4044_v32 = vld [vmem:[%s6149_s1 + $0x84] ss:$8 sps:$4 sm:$0xff]   ;;  %v4048_v34 = vld [vmem:[%s6149_s1 + $0x80] ss:$8 sps:$4 sm:$0xff]  }
   0xc   :  { %2707 = vmatpush1.bf16.msra.mxu0 %v4013_v11  ;;  %2493 = vmatprep.subr.bf16.mxu1 %v4014_v12  ;;  %v4043_v31 = vld [vmem:[%s6149_s1 + $0x570] ss:$8 sps:$4 sm:$0xff]   ;;  %v4046_v33 = vld [vmem:[%s6149_s1 + $0x584] ss:$8 sps:$4 sm:$0xff]   ;;  %v4049_v35 = vld [vmem:[%s6149_s1 + $0x580] ss:$8 sps:$4 sm:$0xff]  }
   0xd   :  { %2708 = vmatprep.subr.bf16.mxu0 %v4016_v13  ;;  %v4050_v36 = vld [vmem:[%s6149_s1 + $0x94] ss:$8 sps:$4 sm:$0xff]   ;;  %v4054_v38 = vld [vmem:[%s6149_s1 + $0x90] ss:$8 sps:$4 sm:$0xff]   ;;  %v4056_v40 = vld [vmem:[%s6149_s1 + $0xa4] ss:$8 sps:$4 sm:$0xff]  }
   0xe   :  { %v4052_v37 = vld [vmem:[%s6149_s1 + $0x594] ss:$8 sps:$4 sm:$0xff]   ;;  %v4055_v39 = vld [vmem:[%s6149_s1 + $0x590] ss:$8 sps:$4 sm:$0xff]   ;;  %v4058_v41 = vld [vmem:[%s6149_s1 + $0x5a4] ss:$8 sps:$4 sm:$0xff]  }
   0xf   :  { %2494 = vmatpush1.bf16.msra.mxu1 %v4018_v14  ;;  %v4060_v42 = vld [vmem:[%s6149_s1 + $0xa0] ss:$8 sps:$4 sm:$0xff]   ;;  %v4062_v44 = vld [vmem:[%s6149_s1 + $0xb4] ss:$8 sps:$4 sm:$0xff]   ;;  %v4066_v46 = vld [vmem:[%s6149_s1 + $0xb0] ss:$8 sps:$4 sm:$0xff]  }
  0x10   :  { %2709 = vmatpush1.bf16.msra.mxu0 %v4019_v15  ;;  %2495 = vmatprep.subr.bf16.mxu1 %v4020_v16  ;;  %v4061_v43 = vld [vmem:[%s6149_s1 + $0x5a0] ss:$8 sps:$4 sm:$0xff]   ;;  %v4064_v45 = vld [vmem:[%s6149_s1 + $0x5b4] ss:$8 sps:$4 sm:$0xff]   ;;  %v4067_v47 = vld [vmem:[%s6149_s1 + $0x5b0] ss:$8 sps:$4 sm:$0xff]  }
  0x11   :  { %2710 = vmatprep.subr.bf16.mxu0 %v4022_v17  ;;  %v27_v48 = vld [vmem:[%s6150_s0] sm:$0xff]  ;;  %v32_v53 = vld [vmem:[%s6150_s0 + $0x28] sm:$0xff]  ;;  %v4074_v58 = vld [vmem:[%s6149_s1 + $0xd4] ss:$8 sps:$4 sm:$0xff]  }
  0x12   :  { %v39_v49 = vld [vmem:[%s6150_s0 + $0x60] sm:$0xff]  ;;  %v44_v54 = vld [vmem:[%s6150_s0 + $0x88] sm:$0xff]  ;;  %v4076_v59 = vld [vmem:[%s6149_s1 + $0x5d4] ss:$8 sps:$4 sm:$0xff]  }
  0x13   :  { %2496 = vmatpush1.bf16.msra.mxu1 %v4024_v18  ;;  %v4068_v50 = vld [vmem:[%s6149_s1 + $0xc4] ss:$8 sps:$4 sm:$0xff]   ;;  %v3470_v52 = vcombine.high %v27_v48, %v39_v49  ;;  %v3480_v55 = vcombine.high %v32_v53, %v44_v54  ;;  %v4072_v56 = vld [vmem:[%s6149_s1 + $0xc0] ss:$8 sps:$4 sm:$0xff]   ;;  %v4078_v60 = vld [vmem:[%s6149_s1 + $0xd0] ss:$8 sps:$4 sm:$0xff]   ;;  %v3469_v8 = vcombine.low %v27_v48, %v39_v49  ;;  %v3479_v10 = vcombine.low %v32_v53, %v44_v54 }
  0x14   :  { %2711 = vmatpush1.bf16.msra.mxu0 %v4025_v19  ;;  %2497 = vmatprep.subr.bf16.mxu1 %v4026_v20  ;;  %v4070_v51 = vld [vmem:[%s6149_s1 + $0x5c4] ss:$8 sps:$4 sm:$0xff]   ;;  %v4073_v57 = vld [vmem:[%s6149_s1 + $0x5c0] ss:$8 sps:$4 sm:$0xff]   ;;  %v4079_v61 = vld [vmem:[%s6149_s1 + $0x5d0] ss:$8 sps:$4 sm:$0xff]  }
  0x15   :  { %2712 = vmatprep.subr.bf16.mxu0 %v4028_v21  ;;  %2519 = vmatprep.mubr.bf16.mxu1 %v3470_v52  ;;  %v4080_v62 = vld [vmem:[%s6149_s1 + $0xe4] ss:$8 sps:$4 sm:$0xff]   ;;  %v4084_v0 = vld [vmem:[%s6149_s1 + $0xe0] ss:$8 sps:$4 sm:$0xff]   ;;  %v4086_v2 = vld [vmem:[%s6149_s1 + $0xf4] ss:$8 sps:$4 sm:$0xff]  }
  0x16   :  { %2734 = vmatprep.mubr.bf16.mxu0 %v3480_v55  ;;  %v4082_v63 = vld [vmem:[%s6149_s1 + $0x5e4] ss:$8 sps:$4 sm:$0xff]   ;;  %v4085_v1 = vld [vmem:[%s6149_s1 + $0x5e0] ss:$8 sps:$4 sm:$0xff]   ;;  %v4088_v3 = vld [vmem:[%s6149_s1 + $0x5f4] ss:$8 sps:$4 sm:$0xff]  }
  0x17   :  { %2498 = vmatpush1.bf16.msra.mxu1 %v4030_v22  ;;  %v4090_v4 = vld [vmem:[%s6149_s1 + $0xf0] ss:$8 sps:$4 sm:$0xff]   ;;  %v4094_v6 = vld [vmem:[%s6149_s1 + $0x104] ss:$8 sps:$4 sm:$0xff]   ;;  %v4092_v9 = vld [vmem:[%s6149_s1 + $0x100] ss:$8 sps:$4 sm:$0xff]  }
  0x18   :  { %2713 = vmatpush1.bf16.msra.mxu0 %v4031_v23  ;;  %2499 = vmatprep.subr.bf16.mxu1 %v4032_v24  ;;  %v4091_v5 = vld [vmem:[%s6149_s1 + $0x5f0] ss:$8 sps:$4 sm:$0xff]   ;;  %v4097_v7 = vld [vmem:[%s6149_s1 + $0x604] ss:$8 sps:$4 sm:$0xff]   ;;  %v4095_v11 = vld [vmem:[%s6149_s1 + $0x600] ss:$8 sps:$4 sm:$0xff]  }
  0x19   :  { %2714 = vmatprep.subr.bf16.mxu0 %v4034_v25  ;;  %v4100_v12 = vld [vmem:[%s6149_s1 + $0x114] ss:$8 sps:$4 sm:$0xff]   ;;  %v4098_v14 = vld [vmem:[%s6149_s1 + $0x110] ss:$8 sps:$4 sm:$0xff]   ;;  %v4106_v16 = vld [vmem:[%s6149_s1 + $0x124] ss:$8 sps:$4 sm:$0xff]  }
  0x1a   :  { %v4103_v13 = vld [vmem:[%s6149_s1 + $0x614] ss:$8 sps:$4 sm:$0xff]   ;;  %v4101_v15 = vld [vmem:[%s6149_s1 + $0x610] ss:$8 sps:$4 sm:$0xff]   ;;  %v4109_v17 = vld [vmem:[%s6149_s1 + $0x624] ss:$8 sps:$4 sm:$0xff]  }
  0x1b   :  { %2500 = vmatpush1.bf16.msra.mxu1 %v4036_v26  ;;  %v4104_v18 = vld [vmem:[%s6149_s1 + $0x120] ss:$8 sps:$4 sm:$0xff]   ;;  %v4112_v20 = vld [vmem:[%s6149_s1 + $0x134] ss:$8 sps:$4 sm:$0xff]   ;;  %v4110_v22 = vld [vmem:[%s6149_s1 + $0x130] ss:$8 sps:$4 sm:$0xff]  }
  0x1c   :  { %2715 = vmatpush1.bf16.msra.mxu0 %v4037_v27  ;;  %2501 = vmatprep.subr.bf16.mxu1 %v4038_v28  ;;  %v4107_v19 = vld [vmem:[%s6149_s1 + $0x620] ss:$8 sps:$4 sm:$0xff]   ;;  %v4115_v21 = vld [vmem:[%s6149_s1 + $0x634] ss:$8 sps:$4 sm:$0xff]   ;;  %v4113_v23 = vld [vmem:[%s6149_s1 + $0x630] ss:$8 sps:$4 sm:$0xff]  }
  0x1d   :  { %2716 = vmatprep.subr.bf16.mxu0 %v4040_v29  ;;  %v4118_v24 = vld [vmem:[%s6149_s1 + $0x144] ss:$8 sps:$4 sm:$0xff]   ;;  %v4116_v26 = vld [vmem:[%s6149_s1 + $0x140] ss:$8 sps:$4 sm:$0xff]   ;;  %v4124_v28 = vld [vmem:[%s6149_s1 + $0x154] ss:$8 sps:$4 sm:$0xff]  }
  0x1e   :  { %v4121_v25 = vld [vmem:[%s6149_s1 + $0x644] ss:$8 sps:$4 sm:$0xff]   ;;  %v4119_v27 = vld [vmem:[%s6149_s1 + $0x640] ss:$8 sps:$4 sm:$0xff]   ;;  %v4127_v29 = vld [vmem:[%s6149_s1 + $0x654] ss:$8 sps:$4 sm:$0xff]  }
  0x1f   :  { %2502 = vmatpush1.bf16.msra.mxu1 %v4042_v30  ;;  %v4122_v30 = vld [vmem:[%s6149_s1 + $0x150] ss:$8 sps:$4 sm:$0xff]   ;;  %v4140_v48 = vld [vmem:[%s6149_s1 + $0x180] ss:$8 sps:$4 sm:$0xff]   ;;  %v4154_v54 = vld [vmem:[%s6149_s1 + $0x1a4] ss:$8 sps:$4 sm:$0xff]  }
  0x20   :  { %2717 = vmatpush1.bf16.msra.mxu0 %v4043_v31  ;;  %2503 = vmatprep.subr.bf16.mxu1 %v4044_v32  ;;  %v4125_v31 = vld [vmem:[%s6149_s1 + $0x650] ss:$8 sps:$4 sm:$0xff]   ;;  %v4130_v32 = vld [vmem:[%s6149_s1 + $0x164] ss:$8 sps:$4 sm:$0xff]   ;;  %v4143_v49 = vld [vmem:[%s6149_s1 + $0x680] ss:$8 sps:$4 sm:$0xff]  }
  0x21   :  { %2718 = vmatprep.subr.bf16.mxu0 %v4046_v33  ;;  %v4133_v33 = vld [vmem:[%s6149_s1 + $0x664] ss:$8 sps:$4 sm:$0xff]   ;;  %v4146_v52 = vld [vmem:[%s6149_s1 + $0x190] ss:$8 sps:$4 sm:$0xff]  }
  0x22   :  { %v4149_v53 = vld [vmem:[%s6149_s1 + $0x690] ss:$8 sps:$4 sm:$0xff]   ;;  %v4157_v55 = vld [vmem:[%s6149_s1 + $0x6a4] ss:$8 sps:$4 sm:$0xff]  }
  0x23   :  { %2504 = vmatpush1.bf16.msra.mxu1 %v4048_v34  ;;  %v4128_v34 = vld [vmem:[%s6149_s1 + $0x160] ss:$8 sps:$4 sm:$0xff]  }
  0x24   :  { %2719 = vmatpush1.bf16.msra.mxu0 %v4049_v35  ;;  %2505 = vmatprep.subr.bf16.mxu1 %v4050_v36  ;;  %v4131_v35 = vld [vmem:[%s6149_s1 + $0x660] ss:$8 sps:$4 sm:$0xff]  }
  0x25   :  { %2720 = vmatprep.subr.bf16.mxu0 %v4052_v37  ;;  %v4975_v36 = vld [vmem:[%s6150_s0 + $0x8] sm:$0xff] }
  0x26   :  { %v4980_v37 = vld [vmem:[%s6150_s0 + $0x68] sm:$0xff] }
  0x27   :  { %2506 = vmatpush1.bf16.msra.mxu1 %v4054_v38  ;;  %v4136_v38 = vld [vmem:[%s6149_s1 + $0x174] ss:$8 sps:$4 sm:$0xff]  }
  0x28   :  { %2721 = vmatpush1.bf16.msra.mxu0 %v4055_v39  ;;  %2507 = vmatprep.subr.bf16.mxu1 %v4056_v40  ;;  %v4139_v39 = vld [vmem:[%s6149_s1 + $0x674] ss:$8 sps:$4 sm:$0xff]   ;;  %v3472_v40 = vcombine.high %v4975_v36, %v4980_v37 }
  0x29   :  { %2722 = vmatprep.subr.bf16.mxu0 %v4058_v41  ;;  %v4993_v41 = vld [vmem:[%s6150_s0 + $0x30] sm:$0xff] }
  0x2b   :  { %2508 = vmatpush1.bf16.msra.mxu1 %v4060_v42  ;;  %v4998_v42 = vld [vmem:[%s6150_s0 + $0x90] sm:$0xff] }
  0x2c   :  { %2723 = vmatpush1.bf16.msra.mxu0 %v4061_v43  ;;  %2509 = vmatprep.subr.bf16.mxu1 %v4062_v44  ;;  %v3482_v43 = vcombine.high %v4993_v41, %v4998_v42  ;;  %v4134_v44 = vld [vmem:[%s6149_s1 + $0x170] ss:$8 sps:$4 sm:$0xff]  }
  0x2d   :  { %2724 = vmatprep.subr.bf16.mxu0 %v4064_v45  ;;  %v4137_v45 = vld [vmem:[%s6149_s1 + $0x670] ss:$8 sps:$4 sm:$0xff]  }
  0x2f   :  { %2510 = vmatpush1.bf16.msra.mxu1 %v4066_v46  ;;  %v4142_v46 = vld [vmem:[%s6149_s1 + $0x184] ss:$8 sps:$4 sm:$0xff]  }
  0x30   :  { %2725 = vmatpush1.bf16.msra.mxu0 %v4067_v47  ;;  %2511 = vmatprep.subr.bf16.mxu1 %v4068_v50  ;;  %v4145_v47 = vld [vmem:[%s6149_s1 + $0x684] ss:$8 sps:$4 sm:$0xff]   ;;  %v4148_v50 = vld [vmem:[%s6149_s1 + $0x194] ss:$8 sps:$4 sm:$0xff]  }
  0x31   :  { %2726 = vmatprep.subr.bf16.mxu0 %v4070_v51  ;;  %v4151_v51 = vld [vmem:[%s6149_s1 + $0x694] ss:$8 sps:$4 sm:$0xff]  }
  0x33   :  { %2512 = vmatpush1.bf16.msra.mxu1 %v4072_v56  ;;  %v4152_v56 = vld [vmem:[%s6149_s1 + $0x1a0] ss:$8 sps:$4 sm:$0xff]  }
  0x34   :  { %2727 = vmatpush1.bf16.msra.mxu0 %v4073_v57  ;;  %2513 = vmatprep.subr.bf16.mxu1 %v4074_v58  ;;  %v4155_v57 = vld [vmem:[%s6149_s1 + $0x6a0] ss:$8 sps:$4 sm:$0xff]   ;;  %v4160_v58 = vld [vmem:[%s6149_s1 + $0x1b4] ss:$8 sps:$4 sm:$0xff]  }
  0x35   :  { %2728 = vmatprep.subr.bf16.mxu0 %v4076_v59  ;;  %v4163_v59 = vld [vmem:[%s6149_s1 + $0x6b4] ss:$8 sps:$4 sm:$0xff]  }
  0x37   :  { %2514 = vmatpush1.bf16.msra.mxu1 %v4078_v60  ;;  %v4158_v60 = vld [vmem:[%s6149_s1 + $0x1b0] ss:$8 sps:$4 sm:$0xff]  }
  0x38   :  { %2729 = vmatpush1.bf16.msra.mxu0 %v4079_v61  ;;  %2515 = vmatprep.subr.bf16.mxu1 %v4080_v62  ;;  %v4161_v61 = vld [vmem:[%s6149_s1 + $0x6b0] ss:$8 sps:$4 sm:$0xff]   ;;  %v4166_v62 = vld [vmem:[%s6149_s1 + $0x1c4] ss:$8 sps:$4 sm:$0xff]  }
  0x39   :  { %2730 = vmatprep.subr.bf16.mxu0 %v4082_v63  ;;  %v4169_v63 = vld [vmem:[%s6149_s1 + $0x6c4] ss:$8 sps:$4 sm:$0xff]  }
  0x3b   :  { %2516 = vmatpush1.bf16.msra.mxu1 %v4084_v0  ;;  %v4164_v0 = vld [vmem:[%s6149_s1 + $0x1c0] ss:$8 sps:$4 sm:$0xff]  }
  0x3c   :  { %2731 = vmatpush1.bf16.msra.mxu0 %v4085_v1  ;;  %2517 = vmatprep.subr.bf16.mxu1 %v4086_v2  ;;  %v4167_v1 = vld [vmem:[%s6149_s1 + $0x6c0] ss:$8 sps:$4 sm:$0xff]   ;;  %v4172_v2 = vld [vmem:[%s6149_s1 + $0x1d4] ss:$8 sps:$4 sm:$0xff]  }
  0x3d   :  { %2732 = vmatprep.subr.bf16.mxu0 %v4088_v3  ;;  %v4175_v3 = vld [vmem:[%s6149_s1 + $0x6d4] ss:$8 sps:$4 sm:$0xff]  }
  0x3f   :  { %2518 = vmatpush1.bf16.msra.mxu1 %v4090_v4  ;;  %v4170_v4 = vld [vmem:[%s6149_s1 + $0x1d0] ss:$8 sps:$4 sm:$0xff]  }
  0x40   :  { %2733 = vmatpush1.bf16.msra.mxu0 %v4091_v5  ;;  %2530 = vmatprep.subr.bf16.mxu1 %v4094_v6  ;;  %v4173_v5 = vld [vmem:[%s6149_s1 + $0x6d0] ss:$8 sps:$4 sm:$0xff]   ;;  %v4178_v6 = vld [vmem:[%s6149_s1 + $0x1e4] ss:$8 sps:$4 sm:$0xff]  }
  0x41   :  { %2745 = vmatprep.subr.bf16.mxu0 %v4097_v7  ;;  %v4181_v7 = vld [vmem:[%s6149_s1 + $0x6e4] ss:$8 sps:$4 sm:$0xff]  }
  0x42   :  { %2520 = vmatmul.mubr.bf16.vlgmr.msra.gmra.mrb[0].mxu1 %v3469_v8  ;;  %v4176_v8 = vld [vmem:[%s6149_s1 + $0x1e0] ss:$8 sps:$4 sm:$0xff]  }
  0x43   :  { %2735 = vmatmul.mubr.bf16.vlgmr.msra.gmra.mrb[0].mxu0 %v3479_v10  ;;  %2531 = vmatpush1.bf16.msra.mxu1 %v4092_v9  ;;  %v4179_v9 = vld [vmem:[%s6149_s1 + $0x6e0] ss:$8 sps:$4 sm:$0xff]   ;;  %v4184_v10 = vld [vmem:[%s6149_s1 + $0x1f4] ss:$8 sps:$4 sm:$0xff]  }
  0x44   :  { %2746 = vmatpush1.bf16.msra.mxu0 %v4095_v11  ;;  %2532 = vmatprep.subr.bf16.mxu1 %v4100_v12  ;;  %v4187_v11 = vld [vmem:[%s6149_s1 + $0x6f4] ss:$8 sps:$4 sm:$0xff]   ;;  %v4182_v12 = vld [vmem:[%s6149_s1 + $0x1f0] ss:$8 sps:$4 sm:$0xff]  }
  0x45   :  { %2747 = vmatprep.subr.bf16.mxu0 %v4103_v13  ;;  %2562 = vmatprep.mubr.bf16.mxu1 %v3472_v40  ;;  %v4185_v13 = vld [vmem:[%s6149_s1 + $0x6f0] ss:$8 sps:$4 sm:$0xff]   ;;  %v4212_v40 = vld [vmem:[%s6149_s1 + $0x240] ss:$8 sps:$4 sm:$0xff]  }
  0x46   :  { %2777 = vmatprep.mubr.bf16.mxu0 %v3482_v43  ;;  %v4223_v43 = vld [vmem:[%s6149_s1 + $0x754] ss:$8 sps:$4 sm:$0xff]  }
  0x47   :  { %2533 = vmatpush1.bf16.msra.mxu1 %v4098_v14  ;;  %v4190_v14 = vld [vmem:[%s6149_s1 + $0x204] ss:$8 sps:$4 sm:$0xff]  }
  0x48   :  { %2748 = vmatpush1.bf16.msra.mxu0 %v4101_v15  ;;  %2534 = vmatprep.subr.bf16.mxu1 %v4106_v16  ;;  %v4193_v15 = vld [vmem:[%s6149_s1 + $0x704] ss:$8 sps:$4 sm:$0xff]   ;;  %v3471_v16 = vcombine.low %v4975_v36, %v4980_v37  ;;  %v4206_v36 = vld [vmem:[%s6149_s1 + $0x230] ss:$8 sps:$4 sm:$0xff]  }
  0x49   :  { %2749 = vmatprep.subr.bf16.mxu0 %v4109_v17  ;;  %v4188_v17 = vld [vmem:[%s6149_s1 + $0x200] ss:$8 sps:$4 sm:$0xff]   ;;  %v4209_v37 = vld [vmem:[%s6149_s1 + $0x730] ss:$8 sps:$4 sm:$0xff]  }
  0x4b   :  { %2535 = vmatpush1.bf16.msra.mxu1 %v4104_v18  ;;  %v3481_v18 = vcombine.low %v4993_v41, %v4998_v42  ;;  %v4215_v41 = vld [vmem:[%s6149_s1 + $0x740] ss:$8 sps:$4 sm:$0xff]   ;;  %v4220_v42 = vld [vmem:[%s6149_s1 + $0x254] ss:$8 sps:$4 sm:$0xff]  }
  0x4c   :  { %2750 = vmatpush1.bf16.msra.mxu0 %v4107_v19  ;;  %2536 = vmatprep.subr.bf16.mxu1 %v4112_v20  ;;  %v4191_v19 = vld [vmem:[%s6149_s1 + $0x700] ss:$8 sps:$4 sm:$0xff]   ;;  %v4196_v20 = vld [vmem:[%s6149_s1 + $0x214] ss:$8 sps:$4 sm:$0xff]  }
  0x4d   :  { %2751 = vmatprep.subr.bf16.mxu0 %v4115_v21  ;;  %v4199_v21 = vld [vmem:[%s6149_s1 + $0x714] ss:$8 sps:$4 sm:$0xff]  }
  0x4f   :  { %2537 = vmatpush1.bf16.msra.mxu1 %v4110_v22  ;;  %v4194_v22 = vld [vmem:[%s6149_s1 + $0x210] ss:$8 sps:$4 sm:$0xff]  }
  0x50   :  { %2752 = vmatpush1.bf16.msra.mxu0 %v4113_v23  ;;  %2538 = vmatprep.subr.bf16.mxu1 %v4118_v24  ;;  %v4197_v23 = vld [vmem:[%s6149_s1 + $0x710] ss:$8 sps:$4 sm:$0xff]  }
  0x51   :  { %2753 = vmatprep.subr.bf16.mxu0 %v4121_v25  ;;  %v5135_v24 = vld [vmem:[%s6150_s0 + $0x10] sm:$0xff] }
  0x52   :  { %v5140_v25 = vld [vmem:[%s6150_s0 + $0x70] sm:$0xff] }
  0x53   :  { %2539 = vmatpush1.bf16.msra.mxu1 %v4116_v26  ;;  %v4202_v26 = vld [vmem:[%s6149_s1 + $0x224] ss:$8 sps:$4 sm:$0xff]  }
  0x54   :  { %2754 = vmatpush1.bf16.msra.mxu0 %v4119_v27  ;;  %2540 = vmatprep.subr.bf16.mxu1 %v4124_v28  ;;  %v4205_v27 = vld [vmem:[%s6149_s1 + $0x724] ss:$8 sps:$4 sm:$0xff]   ;;  %v3474_v28 = vcombine.high %v5135_v24, %v5140_v25 }
  0x55   :  { %2755 = vmatprep.subr.bf16.mxu0 %v4127_v29  ;;  %v5153_v29 = vld [vmem:[%s6150_s0 + $0x38] sm:$0xff] }
  0x57   :  { %2541 = vmatpush1.bf16.msra.mxu1 %v4122_v30  ;;  %v5158_v30 = vld [vmem:[%s6150_s0 + $0x98] sm:$0xff] }
  0x58   :  { %2756 = vmatpush1.bf16.msra.mxu0 %v4125_v31  ;;  %2542 = vmatprep.subr.bf16.mxu1 %v4130_v32  ;;  %v3484_v31 = vcombine.high %v5153_v29, %v5158_v30  ;;  %v4200_v32 = vld [vmem:[%s6149_s1 + $0x220] ss:$8 sps:$4 sm:$0xff]  }
  0x59   :  { %2757 = vmatprep.subr.bf16.mxu0 %v4133_v33  ;;  %v4203_v33 = vld [vmem:[%s6149_s1 + $0x720] ss:$8 sps:$4 sm:$0xff]  }
  0x5b   :  { %2543 = vmatpush1.bf16.msra.mxu1 %v4128_v34  ;;  %v4208_v34 = vld [vmem:[%s6149_s1 + $0x234] ss:$8 sps:$4 sm:$0xff]  }
  0x5c   :  { %2758 = vmatpush1.bf16.msra.mxu0 %v4131_v35  ;;  %2544 = vmatprep.subr.bf16.mxu1 %v4136_v38  ;;  %v4211_v35 = vld [vmem:[%s6149_s1 + $0x734] ss:$8 sps:$4 sm:$0xff]   ;;  %v4214_v38 = vld [vmem:[%s6149_s1 + $0x244] ss:$8 sps:$4 sm:$0xff]  }
  0x5d   :  { %2759 = vmatprep.subr.bf16.mxu0 %v4139_v39  ;;  %v4217_v39 = vld [vmem:[%s6149_s1 + $0x744] ss:$8 sps:$4 sm:$0xff]  }
  0x5f   :  { %2545 = vmatpush1.bf16.msra.mxu1 %v4134_v44  ;;  %v4218_v44 = vld [vmem:[%s6149_s1 + $0x250] ss:$8 sps:$4 sm:$0xff]  }
  0x60   :  { %2760 = vmatpush1.bf16.msra.mxu0 %v4137_v45  ;;  %2546 = vmatprep.subr.bf16.mxu1 %v4142_v46  ;;  %v4221_v45 = vld [vmem:[%s6149_s1 + $0x750] ss:$8 sps:$4 sm:$0xff]   ;;  %v4226_v46 = vld [vmem:[%s6149_s1 + $0x264] ss:$8 sps:$4 sm:$0xff]  }
  0x61   :  { %2761 = vmatprep.subr.bf16.mxu0 %v4145_v47  ;;  %v4229_v47 = vld [vmem:[%s6149_s1 + $0x764] ss:$8 sps:$4 sm:$0xff]  }
  0x63   :  { %2547 = vmatpush1.bf16.msra.mxu1 %v4140_v48  ;;  %v4224_v48 = vld [vmem:[%s6149_s1 + $0x260] ss:$8 sps:$4 sm:$0xff]  }
  0x64   :  { %2762 = vmatpush1.bf16.msra.mxu0 %v4143_v49  ;;  %2548 = vmatprep.subr.bf16.mxu1 %v4148_v50  ;;  %v4227_v49 = vld [vmem:[%s6149_s1 + $0x760] ss:$8 sps:$4 sm:$0xff]   ;;  %v4232_v50 = vld [vmem:[%s6149_s1 + $0x274] ss:$8 sps:$4 sm:$0xff]  }
  0x65   :  { %2763 = vmatprep.subr.bf16.mxu0 %v4151_v51  ;;  %v4235_v51 = vld [vmem:[%s6149_s1 + $0x774] ss:$8 sps:$4 sm:$0xff]  }
  0x67   :  { %2549 = vmatpush1.bf16.msra.mxu1 %v4146_v52  ;;  %v4230_v52 = vld [vmem:[%s6149_s1 + $0x270] ss:$8 sps:$4 sm:$0xff]  }
  0x68   :  { %2764 = vmatpush1.bf16.msra.mxu0 %v4149_v53  ;;  %2550 = vmatprep.subr.bf16.mxu1 %v4154_v54  ;;  %v4233_v53 = vld [vmem:[%s6149_s1 + $0x770] ss:$8 sps:$4 sm:$0xff]   ;;  %v4238_v54 = vld [vmem:[%s6149_s1 + $0x284] ss:$8 sps:$4 sm:$0xff]  }
  0x69   :  { %2765 = vmatprep.subr.bf16.mxu0 %v4157_v55  ;;  %v4241_v55 = vld [vmem:[%s6149_s1 + $0x784] ss:$8 sps:$4 sm:$0xff]  }
  0x6b   :  { %2551 = vmatpush1.bf16.msra.mxu1 %v4152_v56  ;;  %v4236_v56 = vld [vmem:[%s6149_s1 + $0x280] ss:$8 sps:$4 sm:$0xff]  }
  0x6c   :  { %2766 = vmatpush1.bf16.msra.mxu0 %v4155_v57  ;;  %2552 = vmatprep.subr.bf16.mxu1 %v4160_v58  ;;  %v4239_v57 = vld [vmem:[%s6149_s1 + $0x780] ss:$8 sps:$4 sm:$0xff]   ;;  %v4244_v58 = vld [vmem:[%s6149_s1 + $0x294] ss:$8 sps:$4 sm:$0xff]  }
  0x6d   :  { %2767 = vmatprep.subr.bf16.mxu0 %v4163_v59  ;;  %v4247_v59 = vld [vmem:[%s6149_s1 + $0x794] ss:$8 sps:$4 sm:$0xff]  }
  0x6f   :  { %2553 = vmatpush1.bf16.msra.mxu1 %v4158_v60  ;;  %v4242_v60 = vld [vmem:[%s6149_s1 + $0x290] ss:$8 sps:$4 sm:$0xff]  }
  0x70   :  { %2768 = vmatpush1.bf16.msra.mxu0 %v4161_v61  ;;  %2554 = vmatprep.subr.bf16.mxu1 %v4166_v62  ;;  %v4245_v61 = vld [vmem:[%s6149_s1 + $0x790] ss:$8 sps:$4 sm:$0xff]   ;;  %v4250_v62 = vld [vmem:[%s6149_s1 + $0x2a4] ss:$8 sps:$4 sm:$0xff]  }
  0x71   :  { %2769 = vmatprep.subr.bf16.mxu0 %v4169_v63  ;;  %v4253_v63 = vld [vmem:[%s6149_s1 + $0x7a4] ss:$8 sps:$4 sm:$0xff]  }
  0x73   :  { %2555 = vmatpush1.bf16.msra.mxu1 %v4164_v0  ;;  %v4248_v0 = vld [vmem:[%s6149_s1 + $0x2a0] ss:$8 sps:$4 sm:$0xff]  }
  0x74   :  { %2770 = vmatpush1.bf16.msra.mxu0 %v4167_v1  ;;  %2556 = vmatprep.subr.bf16.mxu1 %v4172_v2  ;;  %v4251_v1 = vld [vmem:[%s6149_s1 + $0x7a0] ss:$8 sps:$4 sm:$0xff]   ;;  %v4256_v2 = vld [vmem:[%s6149_s1 + $0x2b4] ss:$8 sps:$4 sm:$0xff]  }
  0x75   :  { %2771 = vmatprep.subr.bf16.mxu0 %v4175_v3  ;;  %v4259_v3 = vld [vmem:[%s6149_s1 + $0x7b4] ss:$8 sps:$4 sm:$0xff]  }
  0x77   :  { %2557 = vmatpush1.bf16.msra.mxu1 %v4170_v4  ;;  %v4254_v4 = vld [vmem:[%s6149_s1 + $0x2b0] ss:$8 sps:$4 sm:$0xff]  }
  0x78   :  { %2772 = vmatpush1.bf16.msra.mxu0 %v4173_v5  ;;  %2558 = vmatprep.subr.bf16.mxu1 %v4178_v6  ;;  %v4257_v5 = vld [vmem:[%s6149_s1 + $0x7b0] ss:$8 sps:$4 sm:$0xff]   ;;  %v4262_v6 = vld [vmem:[%s6149_s1 + $0x2c4] ss:$8 sps:$4 sm:$0xff]  }
  0x79   :  { %2773 = vmatprep.subr.bf16.mxu0 %v4181_v7  ;;  %v4265_v7 = vld [vmem:[%s6149_s1 + $0x7c4] ss:$8 sps:$4 sm:$0xff]  }
  0x7b   :  { %2559 = vmatpush1.bf16.msra.mxu1 %v4176_v8  ;;  %v4260_v8 = vld [vmem:[%s6149_s1 + $0x2c0] ss:$8 sps:$4 sm:$0xff]  }
  0x7c   :  { %2774 = vmatpush1.bf16.msra.mxu0 %v4179_v9  ;;  %2560 = vmatprep.subr.bf16.mxu1 %v4184_v10  ;;  %v4263_v9 = vld [vmem:[%s6149_s1 + $0x7c0] ss:$8 sps:$4 sm:$0xff]   ;;  %v4268_v10 = vld [vmem:[%s6149_s1 + $0x2d4] ss:$8 sps:$4 sm:$0xff]  }
  0x7d   :  { %2775 = vmatprep.subr.bf16.mxu0 %v4187_v11  ;;  %v4271_v11 = vld [vmem:[%s6149_s1 + $0x7d4] ss:$8 sps:$4 sm:$0xff]  }
  0x7f   :  { %2561 = vmatpush1.bf16.msra.mxu1 %v4182_v12  ;;  %v4266_v12 = vld [vmem:[%s6149_s1 + $0x2d0] ss:$8 sps:$4 sm:$0xff]  }
  0x80   :  { %2776 = vmatpush1.bf16.msra.mxu0 %v4185_v13  ;;  %2573 = vmatprep.subr.bf16.mxu1 %v4190_v14  ;;  %v4269_v13 = vld [vmem:[%s6149_s1 + $0x7d0] ss:$8 sps:$4 sm:$0xff]   ;;  %v4274_v14 = vld [vmem:[%s6149_s1 + $0x2e4] ss:$8 sps:$4 sm:$0xff]  }
  0x81   :  { %2788 = vmatprep.subr.bf16.mxu0 %v4193_v15  ;;  %v4277_v15 = vld [vmem:[%s6149_s1 + $0x7e4] ss:$8 sps:$4 sm:$0xff]  }
  0x82   :  { %2563 = vmatmul.mubr.bf16.vlgmr.msra.gmra.mrb[0].mxu1 %v3471_v16  ;;  %v4272_v16 = vld [vmem:[%s6149_s1 + $0x2e0] ss:$8 sps:$4 sm:$0xff]  }
  0x83   :  { %2778 = vmatmul.mubr.bf16.vlgmr.msra.gmra.mrb[0].mxu0 %v3481_v18  ;;  %2574 = vmatpush1.bf16.msra.mxu1 %v4188_v17  ;;  %v4275_v17 = vld [vmem:[%s6149_s1 + $0x7e0] ss:$8 sps:$4 sm:$0xff]   ;;  %v4280_v18 = vld [vmem:[%s6149_s1 + $0x2f4] ss:$8 sps:$4 sm:$0xff]  }
  0x84   :  { %2789 = vmatpush1.bf16.msra.mxu0 %v4191_v19  ;;  %2575 = vmatprep.subr.bf16.mxu1 %v4196_v20  ;;  %v4283_v19 = vld [vmem:[%s6149_s1 + $0x7f4] ss:$8 sps:$4 sm:$0xff]   ;;  %v4278_v20 = vld [vmem:[%s6149_s1 + $0x2f0] ss:$8 sps:$4 sm:$0xff]  }
  0x85   :  { %2790 = vmatprep.subr.bf16.mxu0 %v4199_v21  ;;  %2605 = vmatprep.mubr.bf16.mxu1 %v3474_v28  ;;  %v4281_v21 = vld [vmem:[%s6149_s1 + $0x7f0] ss:$8 sps:$4 sm:$0xff]  }
  0x86   :  { %2820 = vmatprep.mubr.bf16.mxu0 %v3484_v31  ;;  %v5339_v28 = vld [vmem:[%s6150_s0 + $0x18] sm:$0xff] }
  0x87   :  { %2576 = vmatpush1.bf16.msra.mxu1 %v4194_v22  ;;  %v4286_v22 = vld [vmem:[%s6149_s1 + $0x304] ss:$8 sps:$4 sm:$0xff]   ;;  %v5344_v31 = vld [vmem:[%s6150_s0 + $0x78] sm:$0xff] }
  0x88   :  { %2791 = vmatpush1.bf16.msra.mxu0 %v4197_v23  ;;  %2577 = vmatprep.subr.bf16.mxu1 %v4202_v26  ;;  %v4289_v23 = vld [vmem:[%s6149_s1 + $0x804] ss:$8 sps:$4 sm:$0xff]   ;;  %v4284_v26 = vld [vmem:[%s6149_s1 + $0x300] ss:$8 sps:$4 sm:$0xff]  }
  0x89   :  { %2792 = vmatprep.subr.bf16.mxu0 %v4205_v27  ;;  %v4287_v27 = vld [vmem:[%s6149_s1 + $0x800] ss:$8 sps:$4 sm:$0xff]  }
  0x8b   :  { %2578 = vmatpush1.bf16.msra.mxu1 %v4200_v32  ;;  %v3473_v32 = vcombine.low %v5135_v24, %v5140_v25  ;;  %v4295_v24 = vld [vmem:[%s6149_s1 + $0x814] ss:$8 sps:$4 sm:$0xff]   ;;  %v3476_v25 = vcombine.high %v5339_v28, %v5344_v31 }
  0x8c   :  { %2793 = vmatpush1.bf16.msra.mxu0 %v4203_v33  ;;  %2579 = vmatprep.subr.bf16.mxu1 %v4208_v34  ;;  %v3483_v33 = vcombine.low %v5153_v29, %v5158_v30  ;;  %v5353_v34 = vld [vmem:[%s6150_s0 + $0x40] sm:$0xff]  ;;  %v4290_v30 = vld [vmem:[%s6149_s1 + $0x310] ss:$8 sps:$4 sm:$0xff]  }
  0x8d   :  { %2794 = vmatprep.subr.bf16.mxu0 %v4211_v35  ;;  %v5358_v35 = vld [vmem:[%s6150_s0 + $0xa0] sm:$0xff] }
  0x8e   :  { %v3486_v29 = vcombine.high %v5353_v34, %v5358_v35 }
  0x8f   :  { %2580 = vmatpush1.bf16.msra.mxu1 %v4206_v36  ;;  %v4292_v36 = vld [vmem:[%s6149_s1 + $0x314] ss:$8 sps:$4 sm:$0xff]  }
  0x90   :  { %2795 = vmatpush1.bf16.msra.mxu0 %v4209_v37  ;;  %2581 = vmatprep.subr.bf16.mxu1 %v4214_v38  ;;  %v4293_v37 = vld [vmem:[%s6149_s1 + $0x810] ss:$8 sps:$4 sm:$0xff]   ;;  %v4298_v38 = vld [vmem:[%s6149_s1 + $0x324] ss:$8 sps:$4 sm:$0xff]  }
  0x91   :  { %2796 = vmatprep.subr.bf16.mxu0 %v4217_v39  ;;  %v4301_v39 = vld [vmem:[%s6149_s1 + $0x824] ss:$8 sps:$4 sm:$0xff]  }
  0x93   :  { %2582 = vmatpush1.bf16.msra.mxu1 %v4212_v40  ;;  %v4296_v40 = vld [vmem:[%s6149_s1 + $0x320] ss:$8 sps:$4 sm:$0xff]  }
  0x94   :  { %2797 = vmatpush1.bf16.msra.mxu0 %v4215_v41  ;;  %2583 = vmatprep.subr.bf16.mxu1 %v4220_v42  ;;  %v4299_v41 = vld [vmem:[%s6149_s1 + $0x820] ss:$8 sps:$4 sm:$0xff]   ;;  %v4304_v42 = vld [vmem:[%s6149_s1 + $0x334] ss:$8 sps:$4 sm:$0xff]  }
  0x95   :  { %2798 = vmatprep.subr.bf16.mxu0 %v4223_v43  ;;  %v4307_v43 = vld [vmem:[%s6149_s1 + $0x834] ss:$8 sps:$4 sm:$0xff]  }
  0x97   :  { %2584 = vmatpush1.bf16.msra.mxu1 %v4218_v44  ;;  %v4302_v44 = vld [vmem:[%s6149_s1 + $0x330] ss:$8 sps:$4 sm:$0xff]  }
  0x98   :  { %2799 = vmatpush1.bf16.msra.mxu0 %v4221_v45  ;;  %2585 = vmatprep.subr.bf16.mxu1 %v4226_v46  ;;  %v4305_v45 = vld [vmem:[%s6149_s1 + $0x830] ss:$8 sps:$4 sm:$0xff]   ;;  %v4310_v46 = vld [vmem:[%s6149_s1 + $0x344] ss:$8 sps:$4 sm:$0xff]  }
  0x99   :  { %2800 = vmatprep.subr.bf16.mxu0 %v4229_v47  ;;  %v4313_v47 = vld [vmem:[%s6149_s1 + $0x844] ss:$8 sps:$4 sm:$0xff]  }
  0x9b   :  { %2586 = vmatpush1.bf16.msra.mxu1 %v4224_v48  ;;  %v4308_v48 = vld [vmem:[%s6149_s1 + $0x340] ss:$8 sps:$4 sm:$0xff]  }
  0x9c   :  { %2801 = vmatpush1.bf16.msra.mxu0 %v4227_v49  ;;  %2587 = vmatprep.subr.bf16.mxu1 %v4232_v50  ;;  %v4311_v49 = vld [vmem:[%s6149_s1 + $0x840] ss:$8 sps:$4 sm:$0xff]   ;;  %v4316_v50 = vld [vmem:[%s6149_s1 + $0x354] ss:$8 sps:$4 sm:$0xff]  }
  0x9d   :  { %2802 = vmatprep.subr.bf16.mxu0 %v4235_v51  ;;  %v4319_v51 = vld [vmem:[%s6149_s1 + $0x854] ss:$8 sps:$4 sm:$0xff]  }
  0x9f   :  { %2588 = vmatpush1.bf16.msra.mxu1 %v4230_v52  ;;  %v4314_v52 = vld [vmem:[%s6149_s1 + $0x350] ss:$8 sps:$4 sm:$0xff]  }
  0xa0   :  { %2803 = vmatpush1.bf16.msra.mxu0 %v4233_v53  ;;  %2589 = vmatprep.subr.bf16.mxu1 %v4238_v54  ;;  %v4317_v53 = vld [vmem:[%s6149_s1 + $0x850] ss:$8 sps:$4 sm:$0xff]   ;;  %v4322_v54 = vld [vmem:[%s6149_s1 + $0x364] ss:$8 sps:$4 sm:$0xff]  }
  0xa1   :  { %2804 = vmatprep.subr.bf16.mxu0 %v4241_v55  ;;  %v4325_v55 = vld [vmem:[%s6149_s1 + $0x864] ss:$8 sps:$4 sm:$0xff]  }
  0xa3   :  { %2590 = vmatpush1.bf16.msra.mxu1 %v4236_v56  ;;  %v4320_v56 = vld [vmem:[%s6149_s1 + $0x360] ss:$8 sps:$4 sm:$0xff]  }
  0xa4   :  { %2805 = vmatpush1.bf16.msra.mxu0 %v4239_v57  ;;  %2591 = vmatprep.subr.bf16.mxu1 %v4244_v58  ;;  %v4323_v57 = vld [vmem:[%s6149_s1 + $0x860] ss:$8 sps:$4 sm:$0xff]   ;;  %v4328_v58 = vld [vmem:[%s6149_s1 + $0x374] ss:$8 sps:$4 sm:$0xff]  }
  0xa5   :  { %2806 = vmatprep.subr.bf16.mxu0 %v4247_v59  ;;  %v4331_v59 = vld [vmem:[%s6149_s1 + $0x874] ss:$8 sps:$4 sm:$0xff]  }
  0xa7   :  { %2592 = vmatpush1.bf16.msra.mxu1 %v4242_v60  ;;  %v4326_v60 = vld [vmem:[%s6149_s1 + $0x370] ss:$8 sps:$4 sm:$0xff]  }
  0xa8   :  { %2807 = vmatpush1.bf16.msra.mxu0 %v4245_v61  ;;  %2593 = vmatprep.subr.bf16.mxu1 %v4250_v62  ;;  %v4329_v61 = vld [vmem:[%s6149_s1 + $0x870] ss:$8 sps:$4 sm:$0xff]   ;;  %v4334_v62 = vld [vmem:[%s6149_s1 + $0x384] ss:$8 sps:$4 sm:$0xff]  }
  0xa9   :  { %2808 = vmatprep.subr.bf16.mxu0 %v4253_v63  ;;  %v4337_v63 = vld [vmem:[%s6149_s1 + $0x884] ss:$8 sps:$4 sm:$0xff]  }
  0xab   :  { %2594 = vmatpush1.bf16.msra.mxu1 %v4248_v0  ;;  %v4332_v0 = vld [vmem:[%s6149_s1 + $0x380] ss:$8 sps:$4 sm:$0xff]  }
  0xac   :  { %2809 = vmatpush1.bf16.msra.mxu0 %v4251_v1  ;;  %2595 = vmatprep.subr.bf16.mxu1 %v4256_v2  ;;  %v4335_v1 = vld [vmem:[%s6149_s1 + $0x880] ss:$8 sps:$4 sm:$0xff]   ;;  %v4340_v2 = vld [vmem:[%s6149_s1 + $0x394] ss:$8 sps:$4 sm:$0xff]  }
  0xad   :  { %2810 = vmatprep.subr.bf16.mxu0 %v4259_v3  ;;  %v4343_v3 = vld [vmem:[%s6149_s1 + $0x894] ss:$8 sps:$4 sm:$0xff]  }
  0xaf   :  { %2596 = vmatpush1.bf16.msra.mxu1 %v4254_v4  ;;  %v4338_v4 = vld [vmem:[%s6149_s1 + $0x390] ss:$8 sps:$4 sm:$0xff]  }
  0xb0   :  { %2811 = vmatpush1.bf16.msra.mxu0 %v4257_v5  ;;  %2597 = vmatprep.subr.bf16.mxu1 %v4262_v6  ;;  %v4341_v5 = vld [vmem:[%s6149_s1 + $0x890] ss:$8 sps:$4 sm:$0xff]   ;;  %v4346_v6 = vld [vmem:[%s6149_s1 + $0x3a4] ss:$8 sps:$4 sm:$0xff]  }
  0xb1   :  { %2812 = vmatprep.subr.bf16.mxu0 %v4265_v7  ;;  %v4349_v7 = vld [vmem:[%s6149_s1 + $0x8a4] ss:$8 sps:$4 sm:$0xff]  }
  0xb3   :  { %2598 = vmatpush1.bf16.msra.mxu1 %v4260_v8  ;;  %v4344_v8 = vld [vmem:[%s6149_s1 + $0x3a0] ss:$8 sps:$4 sm:$0xff]  }
  0xb4   :  { %2813 = vmatpush1.bf16.msra.mxu0 %v4263_v9  ;;  %2599 = vmatprep.subr.bf16.mxu1 %v4268_v10  ;;  %v4347_v9 = vld [vmem:[%s6149_s1 + $0x8a0] ss:$8 sps:$4 sm:$0xff]   ;;  %v4352_v10 = vld [vmem:[%s6149_s1 + $0x3b4] ss:$8 sps:$4 sm:$0xff]  }
  0xb5   :  { %2814 = vmatprep.subr.bf16.mxu0 %v4271_v11  ;;  %v4355_v11 = vld [vmem:[%s6149_s1 + $0x8b4] ss:$8 sps:$4 sm:$0xff]  }
  0xb7   :  { %2600 = vmatpush1.bf16.msra.mxu1 %v4266_v12  ;;  %v4350_v12 = vld [vmem:[%s6149_s1 + $0x3b0] ss:$8 sps:$4 sm:$0xff]  }
  0xb8   :  { %2815 = vmatpush1.bf16.msra.mxu0 %v4269_v13  ;;  %2601 = vmatprep.subr.bf16.mxu1 %v4274_v14  ;;  %v4353_v13 = vld [vmem:[%s6149_s1 + $0x8b0] ss:$8 sps:$4 sm:$0xff]   ;;  %v4358_v14 = vld [vmem:[%s6149_s1 + $0x3c4] ss:$8 sps:$4 sm:$0xff]  }
  0xb9   :  { %2816 = vmatprep.subr.bf16.mxu0 %v4277_v15  ;;  %v4361_v15 = vld [vmem:[%s6149_s1 + $0x8c4] ss:$8 sps:$4 sm:$0xff]  }
  0xbb   :  { %2602 = vmatpush1.bf16.msra.mxu1 %v4272_v16  ;;  %v4356_v16 = vld [vmem:[%s6149_s1 + $0x3c0] ss:$8 sps:$4 sm:$0xff]  }
  0xbc   :  { %2817 = vmatpush1.bf16.msra.mxu0 %v4275_v17  ;;  %2603 = vmatprep.subr.bf16.mxu1 %v4280_v18  ;;  %v4359_v17 = vld [vmem:[%s6149_s1 + $0x8c0] ss:$8 sps:$4 sm:$0xff]   ;;  %v4364_v18 = vld [vmem:[%s6149_s1 + $0x3d4] ss:$8 sps:$4 sm:$0xff]  }
  0xbd   :  { %2818 = vmatprep.subr.bf16.mxu0 %v4283_v19  ;;  %v4367_v19 = vld [vmem:[%s6149_s1 + $0x8d4] ss:$8 sps:$4 sm:$0xff]  }
  0xbf   :  { %2604 = vmatpush1.bf16.msra.mxu1 %v4278_v20  ;;  %v4362_v20 = vld [vmem:[%s6149_s1 + $0x3d0] ss:$8 sps:$4 sm:$0xff]  }
  0xc0   :  { %2819 = vmatpush1.bf16.msra.mxu0 %v4281_v21  ;;  %2616 = vmatprep.subr.bf16.mxu1 %v4286_v22  ;;  %v4365_v21 = vld [vmem:[%s6149_s1 + $0x8d0] ss:$8 sps:$4 sm:$0xff]   ;;  %v4370_v22 = vld [vmem:[%s6149_s1 + $0x3e4] ss:$8 sps:$4 sm:$0xff]  }
  0xc1   :  { %2831 = vmatprep.subr.bf16.mxu0 %v4289_v23  ;;  %v4373_v23 = vld [vmem:[%s6149_s1 + $0x8e4] ss:$8 sps:$4 sm:$0xff]  }
  0xc2   :  { %2606 = vmatmul.mubr.bf16.vlgmr.msra.gmra.mrb[0].mxu1 %v3473_v32  ;;  %v4376_v32 = vld [vmem:[%s6149_s1 + $0x3f4] ss:$8 sps:$4 sm:$0xff]  }
  0xc3   :  { %2821 = vmatmul.mubr.bf16.vlgmr.msra.gmra.mrb[0].mxu0 %v3483_v33  ;;  %2617 = vmatpush1.bf16.msra.mxu1 %v4284_v26  ;;  %v4368_v26 = vld [vmem:[%s6149_s1 + $0x3e0] ss:$8 sps:$4 sm:$0xff]   ;;  %v4379_v33 = vld [vmem:[%s6149_s1 + $0x8f4] ss:$8 sps:$4 sm:$0xff]  }
  0xc4   :  { %2832 = vmatpush1.bf16.msra.mxu0 %v4287_v27  ;;  %2618 = vmatprep.subr.bf16.mxu1 %v4292_v36  ;;  %v4371_v27 = vld [vmem:[%s6149_s1 + $0x8e0] ss:$8 sps:$4 sm:$0xff]   ;;  %v4374_v36 = vld [vmem:[%s6149_s1 + $0x3f0] ss:$8 sps:$4 sm:$0xff]  }
  0xc5   :  { %2833 = vmatprep.subr.bf16.mxu0 %v4295_v24  ;;  %2648 = vmatprep.mubr.bf16.mxu1 %v3476_v25  ;;  %v4377_v24 = vld [vmem:[%s6149_s1 + $0x8f0] ss:$8 sps:$4 sm:$0xff]   ;;  %v4382_v25 = vld [vmem:[%s6149_s1 + $0x404] ss:$8 sps:$4 sm:$0xff]  }
  0xc6   :  { %2863 = vmatprep.mubr.bf16.mxu0 %v3486_v29  ;;  %v4385_v29 = vld [vmem:[%s6149_s1 + $0x904] ss:$8 sps:$4 sm:$0xff]  }
  0xc7   :  { %2619 = vmatpush1.bf16.msra.mxu1 %v4290_v30  ;;  %v5553_v30 = vld [vmem:[%s6150_s0 + $0x20] sm:$0xff] }
  0xc8   :  { %2834 = vmatpush1.bf16.msra.mxu0 %v4293_v37  ;;  %2620 = vmatprep.subr.bf16.mxu1 %v4298_v38  ;;  %v3475_v37 = vcombine.low %v5339_v28, %v5344_v31  ;;  %v3485_v38 = vcombine.low %v5353_v34, %v5358_v35  ;;  %v4380_v28 = vld [vmem:[%s6149_s1 + $0x400] ss:$8 sps:$4 sm:$0xff]   ;;  %v4388_v34 = vld [vmem:[%s6149_s1 + $0x414] ss:$8 sps:$4 sm:$0xff]  }
  0xc9   :  { %2835 = vmatprep.subr.bf16.mxu0 %v4301_v39  ;;  %v5562_v39 = vld [vmem:[%s6150_s0 + $0x80] sm:$0xff]  ;;  %v4391_v35 = vld [vmem:[%s6149_s1 + $0x914] ss:$8 sps:$4 sm:$0xff]  }
  0xca   :  { %v4383_v31 = vld [vmem:[%s6149_s1 + $0x900] ss:$8 sps:$4 sm:$0xff]  }
  0xcb   :  { %2621 = vmatpush1.bf16.msra.mxu1 %v4296_v40  ;;  %v5567_v40 = vld [vmem:[%s6150_s0 + $0x48] sm:$0xff] }
  0xcc   :  { %2836 = vmatpush1.bf16.msra.mxu0 %v4299_v41  ;;  %2622 = vmatprep.subr.bf16.mxu1 %v4304_v42  ;;  %v5572_v41 = vld [vmem:[%s6150_s0 + $0xa8] sm:$0xff]  ;;  %v3478_v42 = vcombine.high %v5553_v30, %v5562_v39 }
  0xcd   :  { %2837 = vmatprep.subr.bf16.mxu0 %v4307_v43  ;;  %v3488_v43 = vcombine.high %v5567_v40, %v5572_v41 }
  0xcf   :  { %2623 = vmatpush1.bf16.msra.mxu1 %v4302_v44  ;;  %v4386_v44 = vld [vmem:[%s6149_s1 + $0x410] ss:$8 sps:$4 sm:$0xff]  }
  0xd0   :  { %2838 = vmatpush1.bf16.msra.mxu0 %v4305_v45  ;;  %2624 = vmatprep.subr.bf16.mxu1 %v4310_v46  ;;  %v4389_v45 = vld [vmem:[%s6149_s1 + $0x910] ss:$8 sps:$4 sm:$0xff]   ;;  %v4394_v46 = vld [vmem:[%s6149_s1 + $0x424] ss:$8 sps:$4 sm:$0xff]  }
  0xd1   :  { %2839 = vmatprep.subr.bf16.mxu0 %v4313_v47  ;;  %v4397_v47 = vld [vmem:[%s6149_s1 + $0x924] ss:$8 sps:$4 sm:$0xff]  }
  0xd3   :  { %2625 = vmatpush1.bf16.msra.mxu1 %v4308_v48  ;;  %v4392_v48 = vld [vmem:[%s6149_s1 + $0x420] ss:$8 sps:$4 sm:$0xff]  }
  0xd4   :  { %2840 = vmatpush1.bf16.msra.mxu0 %v4311_v49  ;;  %2626 = vmatprep.subr.bf16.mxu1 %v4316_v50  ;;  %v4395_v49 = vld [vmem:[%s6149_s1 + $0x920] ss:$8 sps:$4 sm:$0xff]   ;;  %v4400_v50 = vld [vmem:[%s6149_s1 + $0x434] ss:$8 sps:$4 sm:$0xff]  }
  0xd5   :  { %2841 = vmatprep.subr.bf16.mxu0 %v4319_v51  ;;  %v4403_v51 = vld [vmem:[%s6149_s1 + $0x934] ss:$8 sps:$4 sm:$0xff]  }
  0xd7   :  { %2627 = vmatpush1.bf16.msra.mxu1 %v4314_v52  ;;  %v4398_v52 = vld [vmem:[%s6149_s1 + $0x430] ss:$8 sps:$4 sm:$0xff]  }
  0xd8   :  { %2842 = vmatpush1.bf16.msra.mxu0 %v4317_v53  ;;  %2628 = vmatprep.subr.bf16.mxu1 %v4322_v54  ;;  %v4401_v53 = vld [vmem:[%s6149_s1 + $0x930] ss:$8 sps:$4 sm:$0xff]   ;;  %v4406_v54 = vld [vmem:[%s6149_s1 + $0x444] ss:$8 sps:$4 sm:$0xff]  }
  0xd9   :  { %2843 = vmatprep.subr.bf16.mxu0 %v4325_v55  ;;  %v4409_v55 = vld [vmem:[%s6149_s1 + $0x944] ss:$8 sps:$4 sm:$0xff]  }
  0xdb   :  { %2629 = vmatpush1.bf16.msra.mxu1 %v4320_v56  ;;  %v4404_v56 = vld [vmem:[%s6149_s1 + $0x440] ss:$8 sps:$4 sm:$0xff]  }
  0xdc   :  { %2844 = vmatpush1.bf16.msra.mxu0 %v4323_v57  ;;  %2630 = vmatprep.subr.bf16.mxu1 %v4328_v58  ;;  %v4407_v57 = vld [vmem:[%s6149_s1 + $0x940] ss:$8 sps:$4 sm:$0xff]   ;;  %v4412_v58 = vld [vmem:[%s6149_s1 + $0x454] ss:$8 sps:$4 sm:$0xff]  }
  0xdd   :  { %2845 = vmatprep.subr.bf16.mxu0 %v4331_v59  ;;  %v4415_v59 = vld [vmem:[%s6149_s1 + $0x954] ss:$8 sps:$4 sm:$0xff]  }
  0xdf   :  { %2631 = vmatpush1.bf16.msra.mxu1 %v4326_v60  ;;  %v4410_v60 = vld [vmem:[%s6149_s1 + $0x450] ss:$8 sps:$4 sm:$0xff]  }
  0xe0   :  { %2846 = vmatpush1.bf16.msra.mxu0 %v4329_v61  ;;  %2632 = vmatprep.subr.bf16.mxu1 %v4334_v62  ;;  %v4413_v61 = vld [vmem:[%s6149_s1 + $0x950] ss:$8 sps:$4 sm:$0xff]   ;;  %v4418_v62 = vld [vmem:[%s6149_s1 + $0x464] ss:$8 sps:$4 sm:$0xff]  }
  0xe1   :  { %2847 = vmatprep.subr.bf16.mxu0 %v4337_v63  ;;  %v4421_v63 = vld [vmem:[%s6149_s1 + $0x964] ss:$8 sps:$4 sm:$0xff]  }
  0xe3   :  { %2633 = vmatpush1.bf16.msra.mxu1 %v4332_v0  ;;  %v4416_v0 = vld [vmem:[%s6149_s1 + $0x460] ss:$8 sps:$4 sm:$0xff]  }
  0xe4   :  { %2848 = vmatpush1.bf16.msra.mxu0 %v4335_v1  ;;  %2634 = vmatprep.subr.bf16.mxu1 %v4340_v2  ;;  %v4419_v1 = vld [vmem:[%s6149_s1 + $0x960] ss:$8 sps:$4 sm:$0xff]   ;;  %v4424_v2 = vld [vmem:[%s6149_s1 + $0x474] ss:$8 sps:$4 sm:$0xff]  }
  0xe5   :  { %2849 = vmatprep.subr.bf16.mxu0 %v4343_v3  ;;  %v4427_v3 = vld [vmem:[%s6149_s1 + $0x974] ss:$8 sps:$4 sm:$0xff]  }
  0xe7   :  { %2635 = vmatpush1.bf16.msra.mxu1 %v4338_v4  ;;  %v4422_v4 = vld [vmem:[%s6149_s1 + $0x470] ss:$8 sps:$4 sm:$0xff]  }
  0xe8   :  { %2850 = vmatpush1.bf16.msra.mxu0 %v4341_v5  ;;  %2636 = vmatprep.subr.bf16.mxu1 %v4346_v6  ;;  %v4425_v5 = vld [vmem:[%s6149_s1 + $0x970] ss:$8 sps:$4 sm:$0xff]   ;;  %v4430_v6 = vld [vmem:[%s6149_s1 + $0x484] ss:$8 sps:$4 sm:$0xff]  }
  0xe9   :  { %2851 = vmatprep.subr.bf16.mxu0 %v4349_v7  ;;  %v4433_v7 = vld [vmem:[%s6149_s1 + $0x984] ss:$8 sps:$4 sm:$0xff]  }
  0xeb   :  { %2637 = vmatpush1.bf16.msra.mxu1 %v4344_v8  ;;  %v4428_v8 = vld [vmem:[%s6149_s1 + $0x480] ss:$8 sps:$4 sm:$0xff]  }
  0xec   :  { %2852 = vmatpush1.bf16.msra.mxu0 %v4347_v9  ;;  %2638 = vmatprep.subr.bf16.mxu1 %v4352_v10  ;;  %v4431_v9 = vld [vmem:[%s6149_s1 + $0x980] ss:$8 sps:$4 sm:$0xff]   ;;  %v4436_v10 = vld [vmem:[%s6149_s1 + $0x494] ss:$8 sps:$4 sm:$0xff]  }
  0xed   :  { %2853 = vmatprep.subr.bf16.mxu0 %v4355_v11  ;;  %v4439_v11 = vld [vmem:[%s6149_s1 + $0x994] ss:$8 sps:$4 sm:$0xff]  }
  0xef   :  { %2639 = vmatpush1.bf16.msra.mxu1 %v4350_v12  ;;  %v4434_v12 = vld [vmem:[%s6149_s1 + $0x490] ss:$8 sps:$4 sm:$0xff]  }
  0xf0   :  { %2854 = vmatpush1.bf16.msra.mxu0 %v4353_v13  ;;  %2640 = vmatprep.subr.bf16.mxu1 %v4358_v14  ;;  %v4437_v13 = vld [vmem:[%s6149_s1 + $0x990] ss:$8 sps:$4 sm:$0xff]   ;;  %v4442_v14 = vld [vmem:[%s6149_s1 + $0x4a4] ss:$8 sps:$4 sm:$0xff]  }
  0xf1   :  { %2855 = vmatprep.subr.bf16.mxu0 %v4361_v15  ;;  %v4445_v15 = vld [vmem:[%s6149_s1 + $0x9a4] ss:$8 sps:$4 sm:$0xff]  }
  0xf3   :  { %2641 = vmatpush1.bf16.msra.mxu1 %v4356_v16  ;;  %v4440_v16 = vld [vmem:[%s6149_s1 + $0x4a0] ss:$8 sps:$4 sm:$0xff]  }
  0xf4   :  { %2856 = vmatpush1.bf16.msra.mxu0 %v4359_v17  ;;  %2642 = vmatprep.subr.bf16.mxu1 %v4364_v18  ;;  %v4443_v17 = vld [vmem:[%s6149_s1 + $0x9a0] ss:$8 sps:$4 sm:$0xff]   ;;  %v4448_v18 = vld [vmem:[%s6149_s1 + $0x4b4] ss:$8 sps:$4 sm:$0xff]  }
  0xf5   :  { %2857 = vmatprep.subr.bf16.mxu0 %v4367_v19  ;;  %v4451_v19 = vld [vmem:[%s6149_s1 + $0x9b4] ss:$8 sps:$4 sm:$0xff]  }
  0xf7   :  { %2643 = vmatpush1.bf16.msra.mxu1 %v4362_v20  ;;  %v4446_v20 = vld [vmem:[%s6149_s1 + $0x4b0] ss:$8 sps:$4 sm:$0xff]  }
  0xf8   :  { %2858 = vmatpush1.bf16.msra.mxu0 %v4365_v21  ;;  %2644 = vmatprep.subr.bf16.mxu1 %v4370_v22  ;;  %v4449_v21 = vld [vmem:[%s6149_s1 + $0x9b0] ss:$8 sps:$4 sm:$0xff]   ;;  %v4454_v22 = vld [vmem:[%s6149_s1 + $0x4c4] ss:$8 sps:$4 sm:$0xff]  }
  0xf9   :  { %2859 = vmatprep.subr.bf16.mxu0 %v4373_v23  ;;  %v4457_v23 = vld [vmem:[%s6149_s1 + $0x9c4] ss:$8 sps:$4 sm:$0xff]  }
  0xfb   :  { %2645 = vmatpush1.bf16.msra.mxu1 %v4368_v26  ;;  %v4452_v26 = vld [vmem:[%s6149_s1 + $0x4c0] ss:$8 sps:$4 sm:$0xff]  }
  0xfc   :  { %2860 = vmatpush1.bf16.msra.mxu0 %v4371_v27  ;;  %2646 = vmatprep.subr.bf16.mxu1 %v4376_v32  ;;  %v4455_v27 = vld [vmem:[%s6149_s1 + $0x9c0] ss:$8 sps:$4 sm:$0xff]   ;;  %v4460_v32 = vld [vmem:[%s6149_s1 + $0x4d4] ss:$8 sps:$4 sm:$0xff]  }
  0xfd   :  { %2861 = vmatprep.subr.bf16.mxu0 %v4379_v33  ;;  %v4463_v33 = vld [vmem:[%s6149_s1 + $0x9d4] ss:$8 sps:$4 sm:$0xff]  }
  0xff   :  { %2647 = vmatpush1.bf16.msra.mxu1 %v4374_v36  ;;  %v4458_v36 = vld [vmem:[%s6149_s1 + $0x4d0] ss:$8 sps:$4 sm:$0xff]  }
 0x100   :  { %2862 = vmatpush1.bf16.msra.mxu0 %v4377_v24  ;;  %2659 = vmatprep.subr.bf16.mxu1 %v4382_v25  ;;  %v4461_v24 = vld [vmem:[%s6149_s1 + $0x9d0] ss:$8 sps:$4 sm:$0xff]   ;;  %v4466_v25 = vld [vmem:[%s6149_s1 + $0x4e4] ss:$8 sps:$4 sm:$0xff]  }
 0x101   :  { %2874 = vmatprep.subr.bf16.mxu0 %v4385_v29  ;;  %v4469_v29 = vld [vmem:[%s6149_s1 + $0x9e4] ss:$8 sps:$4 sm:$0xff]  }
 0x102   :  { %2649 = vmatmul.mubr.bf16.vlgmr.msra.gmra.mrb[0].mxu1 %v3475_v37  ;;  %v4464_v37 = vld [vmem:[%s6149_s1 + $0x4e0] ss:$8 sps:$4 sm:$0xff]  }
 0x103   :  { %2864 = vmatmul.mubr.bf16.vlgmr.msra.gmra.mrb[0].mxu0 %v3485_v38  ;;  %2660 = vmatpush1.bf16.msra.mxu1 %v4380_v28  ;;  %v4467_v38 = vld [vmem:[%s6149_s1 + $0x9e0] ss:$8 sps:$4 sm:$0xff]   ;;  %v4472_v28 = vld [vmem:[%s6149_s1 + $0x4f4] ss:$8 sps:$4 sm:$0xff]  }
 0x104   :  { %2875 = vmatpush1.bf16.msra.mxu0 %v4383_v31  ;;  %2661 = vmatprep.subr.bf16.mxu1 %v4388_v34  ;;  %v4475_v31 = vld [vmem:[%s6149_s1 + $0x9f4] ss:$8 sps:$4 sm:$0xff]   ;;  %v4470_v34 = vld [vmem:[%s6149_s1 + $0x4f0] ss:$8 sps:$4 sm:$0xff]  }
 0x105   :  { %2876 = vmatprep.subr.bf16.mxu0 %v4391_v35  ;;  %2691 = vmatprep.mubr.bf16.mxu1 %v3478_v42  ;;  %v4473_v35 = vld [vmem:[%s6149_s1 + $0x9f0] ss:$8 sps:$4 sm:$0xff]   ;;  %v4478_v42 = vld [vmem:[%s6149_s1 + $0xa04] ss:$8 sps:$4 sm:$0xff]  }
 0x106   :  { %2906 = vmatprep.mubr.bf16.mxu0 %v3488_v43  ;;  %v5770_v43 = vld [vmem:[%s6150_s0 + $0x50] sm:$0xff] }
 0x107   :  { %2662 = vmatpush1.bf16.msra.mxu1 %v4386_v44  ;;  %v5775_v44 = vld [vmem:[%s6150_s0 + $0xb0] sm:$0xff] }
 0x108   :  { %2877 = vmatpush1.bf16.msra.mxu0 %v4389_v45  ;;  %2663 = vmatprep.subr.bf16.mxu1 %v4394_v46  ;;  %v3477_v45 = vcombine.low %v5553_v30, %v5562_v39  ;;  %v3487_v46 = vcombine.low %v5567_v40, %v5572_v41  ;;  %v4479_v30 = vld [vmem:[%s6149_s1 + $0xa10] ss:$8 sps:$4 sm:$0xff]   ;;  %v4484_v39 = vld [vmem:[%s6149_s1 + $0xa24] ss:$8 sps:$4 sm:$0xff]   ;;  %v4482_v40 = vld [vmem:[%s6149_s1 + $0xa20] ss:$8 sps:$4 sm:$0xff]  }
 0x109   :  { %2878 = vmatprep.subr.bf16.mxu0 %v4397_v47  ;;  %v4476_v47 = vld [vmem:[%s6149_s1 + $0xa00] ss:$8 sps:$4 sm:$0xff]   ;;  %v4487_v41 = vld [vmem:[%s6149_s1 + $0xa34] ss:$8 sps:$4 sm:$0xff]  }
 0x10b   :  { %2664 = vmatpush1.bf16.msra.mxu1 %v4392_v48  ;;  %v3490_v48 = vcombine.high %v5770_v43, %v5775_v44 }
 0x10c   :  { %2879 = vmatpush1.bf16.msra.mxu0 %v4395_v49  ;;  %2665 = vmatprep.subr.bf16.mxu1 %v4400_v50  ;;  %v4481_v49 = vld [vmem:[%s6149_s1 + $0xa14] ss:$8 sps:$4 sm:$0xff]   ;;  %v4485_v50 = vld [vmem:[%s6149_s1 + $0xa30] ss:$8 sps:$4 sm:$0xff]  }
 0x10d   :  { %2880 = vmatprep.subr.bf16.mxu0 %v4403_v51  ;;  %v4490_v51 = vld [vmem:[%s6149_s1 + $0xa44] ss:$8 sps:$4 sm:$0xff]  }
 0x10f   :  { %2666 = vmatpush1.bf16.msra.mxu1 %v4398_v52  ;;  %v4488_v52 = vld [vmem:[%s6149_s1 + $0xa40] ss:$8 sps:$4 sm:$0xff]  }
 0x110   :  { %2881 = vmatpush1.bf16.msra.mxu0 %v4401_v53  ;;  %2667 = vmatprep.subr.bf16.mxu1 %v4406_v54  ;;  %v4493_v53 = vld [vmem:[%s6149_s1 + $0xa54] ss:$8 sps:$4 sm:$0xff]   ;;  %v4491_v54 = vld [vmem:[%s6149_s1 + $0xa50] ss:$8 sps:$4 sm:$0xff]  }
 0x111   :  { %2882 = vmatprep.subr.bf16.mxu0 %v4409_v55  ;;  %v4496_v55 = vld [vmem:[%s6149_s1 + $0xa64] ss:$8 sps:$4 sm:$0xff]  }
 0x113   :  { %2668 = vmatpush1.bf16.msra.mxu1 %v4404_v56  ;;  %v4494_v56 = vld [vmem:[%s6149_s1 + $0xa60] ss:$8 sps:$4 sm:$0xff]  }
 0x114   :  { %2883 = vmatpush1.bf16.msra.mxu0 %v4407_v57  ;;  %2669 = vmatprep.subr.bf16.mxu1 %v4412_v58  ;;  %v4499_v57 = vld [vmem:[%s6149_s1 + $0xa74] ss:$8 sps:$4 sm:$0xff]   ;;  %v4497_v58 = vld [vmem:[%s6149_s1 + $0xa70] ss:$8 sps:$4 sm:$0xff]  }
 0x115   :  { %2884 = vmatprep.subr.bf16.mxu0 %v4415_v59  ;;  %v4502_v59 = vld [vmem:[%s6149_s1 + $0xa84] ss:$8 sps:$4 sm:$0xff]  }
 0x117   :  { %2670 = vmatpush1.bf16.msra.mxu1 %v4410_v60  ;;  %v4500_v60 = vld [vmem:[%s6149_s1 + $0xa80] ss:$8 sps:$4 sm:$0xff]  }
 0x118   :  { %2885 = vmatpush1.bf16.msra.mxu0 %v4413_v61  ;;  %2671 = vmatprep.subr.bf16.mxu1 %v4418_v62  ;;  %v4505_v61 = vld [vmem:[%s6149_s1 + $0xa94] ss:$8 sps:$4 sm:$0xff]   ;;  %v4503_v62 = vld [vmem:[%s6149_s1 + $0xa90] ss:$8 sps:$4 sm:$0xff]  }
 0x119   :  { %2886 = vmatprep.subr.bf16.mxu0 %v4421_v63  ;;  %v4508_v63 = vld [vmem:[%s6149_s1 + $0xaa4] ss:$8 sps:$4 sm:$0xff]  }
 0x11b   :  { %2672 = vmatpush1.bf16.msra.mxu1 %v4416_v0  ;;  %v4506_v0 = vld [vmem:[%s6149_s1 + $0xaa0] ss:$8 sps:$4 sm:$0xff]  }
 0x11c   :  { %2887 = vmatpush1.bf16.msra.mxu0 %v4419_v1  ;;  %2673 = vmatprep.subr.bf16.mxu1 %v4424_v2  ;;  %v4511_v1 = vld [vmem:[%s6149_s1 + $0xab4] ss:$8 sps:$4 sm:$0xff]   ;;  %v4509_v2 = vld [vmem:[%s6149_s1 + $0xab0] ss:$8 sps:$4 sm:$0xff]  }
 0x11d   :  { %2888 = vmatprep.subr.bf16.mxu0 %v4427_v3  ;;  %v4514_v3 = vld [vmem:[%s6149_s1 + $0xac4] ss:$8 sps:$4 sm:$0xff]  }
 0x11f   :  { %2674 = vmatpush1.bf16.msra.mxu1 %v4422_v4  ;;  %v4512_v4 = vld [vmem:[%s6149_s1 + $0xac0] ss:$8 sps:$4 sm:$0xff]  }
 0x120   :  { %2889 = vmatpush1.bf16.msra.mxu0 %v4425_v5  ;;  %2675 = vmatprep.subr.bf16.mxu1 %v4430_v6  ;;  %v4517_v5 = vld [vmem:[%s6149_s1 + $0xad4] ss:$8 sps:$4 sm:$0xff]   ;;  %v4515_v6 = vld [vmem:[%s6149_s1 + $0xad0] ss:$8 sps:$4 sm:$0xff]  }
 0x121   :  { %2890 = vmatprep.subr.bf16.mxu0 %v4433_v7  ;;  %v4520_v7 = vld [vmem:[%s6149_s1 + $0xae4] ss:$8 sps:$4 sm:$0xff]  }
 0x123   :  { %2676 = vmatpush1.bf16.msra.mxu1 %v4428_v8  ;;  %v4518_v8 = vld [vmem:[%s6149_s1 + $0xae0] ss:$8 sps:$4 sm:$0xff]  }
 0x124   :  { %2891 = vmatpush1.bf16.msra.mxu0 %v4431_v9  ;;  %2677 = vmatprep.subr.bf16.mxu1 %v4436_v10  ;;  %v4523_v9 = vld [vmem:[%s6149_s1 + $0xaf4] ss:$8 sps:$4 sm:$0xff]   ;;  %v4521_v10 = vld [vmem:[%s6149_s1 + $0xaf0] ss:$8 sps:$4 sm:$0xff]  }
 0x125   :  { %2892 = vmatprep.subr.bf16.mxu0 %v4439_v11  ;;  %v4526_v11 = vld [vmem:[%s6149_s1 + $0xb04] ss:$8 sps:$4 sm:$0xff]  }
 0x127   :  { %2678 = vmatpush1.bf16.msra.mxu1 %v4434_v12  ;;  %v5882_v12 = vld [vmem:[%s6150_s0 + $0x58] sm:$0xff] }
 0x128   :  { %2893 = vmatpush1.bf16.msra.mxu0 %v4437_v13  ;;  %2679 = vmatprep.subr.bf16.mxu1 %v4442_v14  ;;  %v5887_v13 = vld [vmem:[%s6150_s0 + $0xb8] sm:$0xff]  ;;  %v3489_v14 = vcombine.low %v5770_v43, %v5775_v44  ;;  %v4578_v44 = vld [vmem:[%s6151_s3 + $0x20] ss:$8 sps:$4 sm:$0xff]  }
 0x129   :  { %2894 = vmatprep.subr.bf16.mxu0 %v4445_v15  ;;  %v4524_v15 = vld [vmem:[%s6149_s1 + $0xb00] ss:$8 sps:$4 sm:$0xff]   ;;  %v4551_v43 = vld [vmem:[%s6149_s1 + $0xb90] ss:$8 sps:$4 sm:$0xff]  }
 0x12b   :  { %2680 = vmatpush1.bf16.msra.mxu1 %v4440_v16  ;;  %v3492_v16 = vcombine.high %v5882_v12, %v5887_v13 }
 0x12c   :  { %2895 = vmatpush1.bf16.msra.mxu0 %v4443_v17  ;;  %2681 = vmatprep.subr.bf16.mxu1 %v4448_v18  ;;  %v4529_v17 = vld [vmem:[%s6149_s1 + $0xb14] ss:$8 sps:$4 sm:$0xff]   ;;  %v4527_v18 = vld [vmem:[%s6149_s1 + $0xb10] ss:$8 sps:$4 sm:$0xff]  }
 0x12d   :  { %2896 = vmatprep.subr.bf16.mxu0 %v4451_v19  ;;  %v4532_v19 = vld [vmem:[%s6149_s1 + $0xb24] ss:$8 sps:$4 sm:$0xff]  }
 0x12f   :  { %2682 = vmatpush1.bf16.msra.mxu1 %v4446_v20  ;;  %v4530_v20 = vld [vmem:[%s6149_s1 + $0xb20] ss:$8 sps:$4 sm:$0xff]  }
 0x130   :  { %2897 = vmatpush1.bf16.msra.mxu0 %v4449_v21  ;;  %2683 = vmatprep.subr.bf16.mxu1 %v4454_v22  ;;  %v4535_v21 = vld [vmem:[%s6149_s1 + $0xb34] ss:$8 sps:$4 sm:$0xff]   ;;  %v4533_v22 = vld [vmem:[%s6149_s1 + $0xb30] ss:$8 sps:$4 sm:$0xff]  }
 0x131   :  { %2898 = vmatprep.subr.bf16.mxu0 %v4457_v23  ;;  %v4538_v23 = vld [vmem:[%s6149_s1 + $0xb44] ss:$8 sps:$4 sm:$0xff]  }
 0x133   :  { %2684 = vmatpush1.bf16.msra.mxu1 %v4452_v26  ;;  %v4536_v26 = vld [vmem:[%s6149_s1 + $0xb40] ss:$8 sps:$4 sm:$0xff]  }
 0x134   :  { %2899 = vmatpush1.bf16.msra.mxu0 %v4455_v27  ;;  %2685 = vmatprep.subr.bf16.mxu1 %v4460_v32  ;;  %v4541_v27 = vld [vmem:[%s6149_s1 + $0xb54] ss:$8 sps:$4 sm:$0xff]   ;;  %v4539_v32 = vld [vmem:[%s6149_s1 + $0xb50] ss:$8 sps:$4 sm:$0xff]  }
 0x135   :  { %2900 = vmatprep.subr.bf16.mxu0 %v4463_v33  ;;  %v4544_v33 = vld [vmem:[%s6149_s1 + $0xb64] ss:$8 sps:$4 sm:$0xff]  }
 0x137   :  { %2686 = vmatpush1.bf16.msra.mxu1 %v4458_v36  ;;  %v4542_v36 = vld [vmem:[%s6149_s1 + $0xb60] ss:$8 sps:$4 sm:$0xff]  }
 0x138   :  { %2901 = vmatpush1.bf16.msra.mxu0 %v4461_v24  ;;  %2687 = vmatprep.subr.bf16.mxu1 %v4466_v25  ;;  %v4547_v24 = vld [vmem:[%s6149_s1 + $0xb74] ss:$8 sps:$4 sm:$0xff]   ;;  %v4545_v25 = vld [vmem:[%s6149_s1 + $0xb70] ss:$8 sps:$4 sm:$0xff]  }
 0x139   :  { %2902 = vmatprep.subr.bf16.mxu0 %v4469_v29  ;;  %v4572_v29 = vld [vmem:[%s6151_s3] ss:$8 sps:$4 sm:$0xff]  }
 0x13b   :  { %2688 = vmatpush1.bf16.msra.mxu1 %v4464_v37  ;;  %v4574_v37 = vld [vmem:[%s6151_s3 + $0x4] ss:$8 sps:$4 sm:$0xff]  }
 0x13c   :  { %2903 = vmatpush1.bf16.msra.mxu0 %v4467_v38  ;;  %2689 = vmatprep.subr.bf16.mxu1 %v4472_v28  ;;  %v4550_v38 = vld [vmem:[%s6149_s1 + $0xb84] ss:$8 sps:$4 sm:$0xff]   ;;  %v4577_v28 = vld [vmem:[%s6151_s3 + $0x14] ss:$8 sps:$4 sm:$0xff]  }
 0x13d   :  { %2904 = vmatprep.subr.bf16.mxu0 %v4475_v31  ;;  %v4548_v31 = vld [vmem:[%s6149_s1 + $0xb80] ss:$8 sps:$4 sm:$0xff]  }
 0x13f   :  { %2690 = vmatpush1.bf16.msra.mxu1 %v4470_v34  ;;  %v4575_v34 = vld [vmem:[%s6151_s3 + $0x10] ss:$8 sps:$4 sm:$0xff]  }
 0x140   :  { %2905 = vmatpush1.bf16.msra.mxu0 %v4473_v35  ;;  %3213 = vmatprep.subr.bf16.mxu1 %v4574_v37  ;;  %v4580_v35 = vld [vmem:[%s6151_s3 + $0x24] ss:$8 sps:$4 sm:$0xff]  }
 0x141   :  { %2917 = vmatprep.subr.bf16.mxu0 %v4478_v42  ;;  %v4553_v42 = vld [vmem:[%s6149_s1 + $0xb94] ss:$8 sps:$4 sm:$0xff]  }
 0x142   :  { %2692 = vmatmul.mubr.bf16.vlgmr.msra.gmra.mrb[0].mxu1 %v3477_v45  ;;  %v4583_v45 = vld [vmem:[%s6151_s3 + $0x34] ss:$8 sps:$4 sm:$0xff]  }
 0x143   :  { %2907 = vmatmul.mubr.bf16.vlgmr.msra.gmra.mrb[0].mxu0 %v3487_v46  ;;  %3214 = vmatpush1.bf16.msra.mxu1 %v4572_v29  ;;  %v4556_v46 = vld [vmem:[%s6149_s1 + $0xba4] ss:$8 sps:$4 sm:$0xff]  }
 0x144   :  { %2918 = vmatpush1.bf16.msra.mxu0 %v4476_v47  ;;  %2949 = vmatprep.mubr.bf16.mxu0 %v3490_v48  ;;  %v4554_v47 = vld [vmem:[%s6149_s1 + $0xba0] ss:$8 sps:$4 sm:$0xff]   ;;  %v4581_v48 = vld [vmem:[%s6151_s3 + $0x30] ss:$8 sps:$4 sm:$0xff]  }
 0x145   :  { %2919 = vmatprep.subr.bf16.mxu0 %v4481_v49  ;;  %3215 = vmatprep.subr.bf16.mxu1 %v4577_v28  ;;  %v4586_v49 = vld [vmem:[%s6151_s3 + $0x44] ss:$8 sps:$4 sm:$0xff]  }
 0x147   :  { %3216 = vmatpush1.bf16.msra.mxu1 %v4575_v34 }
 0x148   :  { %2920 = vmatpush1.bf16.msra.mxu0 %v4479_v30  ;;  %3217 = vmatprep.subr.bf16.mxu1 %v4580_v35  ;;  %v4559_v30 = vld [vmem:[%s6149_s1 + $0xbb4] ss:$8 sps:$4 sm:$0xff]  }
 0x149   :  { %2921 = vmatprep.subr.bf16.mxu0 %v4484_v39  ;;  %v4557_v39 = vld [vmem:[%s6149_s1 + $0xbb0] ss:$8 sps:$4 sm:$0xff]  }
 0x14b   :  { %3218 = vmatpush1.bf16.msra.mxu1 %v4578_v44 }
 0x14c   :  { %2922 = vmatpush1.bf16.msra.mxu0 %v4482_v40  ;;  %3219 = vmatprep.subr.bf16.mxu1 %v4583_v45  ;;  %v4584_v40 = vld [vmem:[%s6151_s3 + $0x40] ss:$8 sps:$4 sm:$0xff]  }
 0x14d   :  { %2923 = vmatprep.subr.bf16.mxu0 %v4487_v41  ;;  %v4589_v41 = vld [vmem:[%s6151_s3 + $0x54] ss:$8 sps:$4 sm:$0xff]  }
 0x14f   :  { %3220 = vmatpush1.bf16.msra.mxu1 %v4581_v48 }
 0x150   :  { %2924 = vmatpush1.bf16.msra.mxu0 %v4485_v50  ;;  %3221 = vmatprep.subr.bf16.mxu1 %v4586_v49  ;;  %v4562_v50 = vld [vmem:[%s6149_s1 + $0xbc4] ss:$8 sps:$4 sm:$0xff]  }
 0x151   :  { %2925 = vmatprep.subr.bf16.mxu0 %v4490_v51  ;;  %v4587_v51 = vld [vmem:[%s6151_s3 + $0x50] ss:$8 sps:$4 sm:$0xff]  }
 0x153   :  { %3222 = vmatpush1.bf16.msra.mxu1 %v4584_v40  ;;  %v4623_v40 = vld [vmem:[%s6152_s5 + $0x8] sm:$0xff]  }
 0x154   :  { %2926 = vmatpush1.bf16.msra.mxu0 %v4488_v52  ;;  %v4560_v52 = vld [vmem:[%s6149_s1 + $0xbc0] ss:$8 sps:$4 sm:$0xff]   ;;  %3223 = vmatprep.subr.bf16.mxu1 %v4589_v41  ;;  %v4624_v41 = vld [vmem:[%s6152_s5 + $0x50] sm:$0xff]  }
 0x155   :  { %2927 = vmatprep.subr.bf16.mxu0 %v4493_v53  ;;  %v4592_v53 = vld [vmem:[%s6151_s3 + $0x64] ss:$8 sps:$4 sm:$0xff]  }
 0x157   :  { %3224 = vmatpush1.bf16.msra.mxu1 %v4587_v51  ;;  %v4626_v51 = vld [vmem:[%s6152_s5 + $0x58] sm:$0xff]  }
 0x158   :  { %2928 = vmatpush1.bf16.msra.mxu0 %v4491_v54  ;;  %v4565_v54 = vld [vmem:[%s6149_s1 + $0xbd4] ss:$8 sps:$4 sm:$0xff]   ;;  %3225 = vmatprep.subr.bf16.mxu1 %v4592_v53  ;;  %v4628_v53 = vld [vmem:[%s6152_s5 + $0x60] sm:$0xff]  }
 0x159   :  { %2929 = vmatprep.subr.bf16.mxu0 %v4496_v55  ;;  %v4590_v55 = vld [vmem:[%s6151_s3 + $0x60] ss:$8 sps:$4 sm:$0xff]  }
 0x15b   :  { %3226 = vmatpush1.bf16.msra.mxu1 %v4590_v55  ;;  %v4630_v55 = vld [vmem:[%s6152_s5 + $0x68] sm:$0xff]  }
 0x15c   :  { %2930 = vmatpush1.bf16.msra.mxu0 %v4494_v56  ;;  %v4563_v56 = vld [vmem:[%s6149_s1 + $0xbd0] ss:$8 sps:$4 sm:$0xff]  }
 0x15d   :  { %2931 = vmatprep.subr.bf16.mxu0 %v4499_v57  ;;  %v4595_v57 = vld [vmem:[%s6151_s3 + $0x74] ss:$8 sps:$4 sm:$0xff]  }
 0x15e   :  { %3227 = vmatprep.subr.bf16.mxu1 %v4595_v57  ;;  %v4632_v57 = vld [vmem:[%s6152_s5 + $0x70] sm:$0xff]  }
 0x160   :  { %2932 = vmatpush1.bf16.msra.mxu0 %v4497_v58  ;;  %v4568_v58 = vld [vmem:[%s6149_s1 + $0xbe4] ss:$8 sps:$4 sm:$0xff]  }
 0x161   :  { %2933 = vmatprep.subr.bf16.mxu0 %v4502_v59  ;;  %v4593_v59 = vld [vmem:[%s6151_s3 + $0x70] ss:$8 sps:$4 sm:$0xff]  }
 0x162   :  { %3228 = vmatpush1.bf16.msra.mxu1 %v4593_v59  ;;  %v4634_v59 = vld [vmem:[%s6152_s5 + $0x78] sm:$0xff]  }
 0x164   :  { %2934 = vmatpush1.bf16.msra.mxu0 %v4500_v60  ;;  %v4566_v60 = vld [vmem:[%s6149_s1 + $0xbe0] ss:$8 sps:$4 sm:$0xff]  }
 0x165   :  { %2935 = vmatprep.subr.bf16.mxu0 %v4505_v61  ;;  %v4598_v61 = vld [vmem:[%s6151_s3 + $0x84] ss:$8 sps:$4 sm:$0xff]  }
 0x166   :  { %3229 = vmatprep.subr.bf16.mxu1 %v4598_v61  ;;  %v3041_v61 = vld [vmem:[%s6154_s4] sm:$0x3] }
 0x168   :  { %2936 = vmatpush1.bf16.msra.mxu0 %v4503_v62  ;;  %v4571_v62 = vld [vmem:[%s6149_s1 + $0xbf4] ss:$8 sps:$4 sm:$0xff]  }
 0x169   :  { %2937 = vmatprep.subr.bf16.mxu0 %v4508_v63  ;;  %v4596_v63 = vld [vmem:[%s6151_s3 + $0x80] ss:$8 sps:$4 sm:$0xff]  }
 0x16a   :  { %3230 = vmatpush1.bf16.msra.mxu1 %v4596_v63 }
 0x16c   :  { %2938 = vmatpush1.bf16.msra.mxu0 %v4506_v0  ;;  %v4569_v0 = vld [vmem:[%s6149_s1 + $0xbf0] ss:$8 sps:$4 sm:$0xff]  }
 0x16d   :  { %2939 = vmatprep.subr.bf16.mxu0 %v4511_v1  ;;  %v4601_v1 = vld [vmem:[%s6151_s3 + $0x94] ss:$8 sps:$4 sm:$0xff]  }
 0x16e   :  { %3231 = vmatprep.subr.bf16.mxu1 %v4601_v1 }
 0x170   :  { %2940 = vmatpush1.bf16.msra.mxu0 %v4509_v2  ;;  %v3491_v2 = vcombine.low %v5882_v12, %v5887_v13 }
 0x171   :  { %2941 = vmatprep.subr.bf16.mxu0 %v4514_v3  ;;  %v4599_v3 = vld [vmem:[%s6151_s3 + $0x90] ss:$8 sps:$4 sm:$0xff]  }
 0x172   :  { %3232 = vmatpush1.bf16.msra.mxu1 %v4599_v3 }
 0x174   :  { %2942 = vmatpush1.bf16.msra.mxu0 %v4512_v4  ;;  %v4604_v4 = vld [vmem:[%s6151_s3 + $0xa4] ss:$8 sps:$4 sm:$0xff]  }
 0x175   :  { %2943 = vmatprep.subr.bf16.mxu0 %v4517_v5  ;;  %v4602_v5 = vld [vmem:[%s6151_s3 + $0xa0] ss:$8 sps:$4 sm:$0xff]   ;;  %3233 = vmatprep.subr.bf16.mxu1 %v4604_v4 }
 0x176   :  { %3234 = vmatpush1.bf16.msra.mxu1 %v4602_v5 }
 0x178   :  { %2944 = vmatpush1.bf16.msra.mxu0 %v4515_v6  ;;  %v4607_v6 = vld [vmem:[%s6151_s3 + $0xb4] ss:$8 sps:$4 sm:$0xff]  }
 0x179   :  { %2945 = vmatprep.subr.bf16.mxu0 %v4520_v7  ;;  %v4605_v7 = vld [vmem:[%s6151_s3 + $0xb0] ss:$8 sps:$4 sm:$0xff]   ;;  %3235 = vmatprep.subr.bf16.mxu1 %v4607_v6 }
 0x17a   :  { %3236 = vmatpush1.bf16.msra.mxu1 %v4605_v7 }
 0x17c   :  { %2946 = vmatpush1.bf16.msra.mxu0 %v4518_v8  ;;  %v4610_v8 = vld [vmem:[%s6151_s3 + $0xc4] ss:$8 sps:$4 sm:$0xff]  }
 0x17d   :  { %2947 = vmatprep.subr.bf16.mxu0 %v4523_v9  ;;  %v4608_v9 = vld [vmem:[%s6151_s3 + $0xc0] ss:$8 sps:$4 sm:$0xff]   ;;  %3237 = vmatprep.subr.bf16.mxu1 %v4610_v8 }
 0x17e   :  { %3238 = vmatpush1.bf16.msra.mxu1 %v4608_v9 }
 0x180   :  { %2948 = vmatpush1.bf16.msra.mxu0 %v4521_v10  ;;  %v4613_v10 = vld [vmem:[%s6151_s3 + $0xd4] ss:$8 sps:$4 sm:$0xff]  }
 0x181   :  { %2960 = vmatprep.subr.bf16.mxu0 %v4526_v11  ;;  %v4611_v11 = vld [vmem:[%s6151_s3 + $0xd0] ss:$8 sps:$4 sm:$0xff]   ;;  %3239 = vmatprep.subr.bf16.mxu1 %v4613_v10 }
 0x182   :  { %3240 = vmatpush1.bf16.msra.mxu1 %v4611_v11 }
 0x183   :  { %2950 = vmatmul.mubr.bf16.vlgmr.msra.gmra.mrb[0].mxu0 %v3489_v14  ;;  %v4616_v14 = vld [vmem:[%s6151_s3 + $0xe4] ss:$8 sps:$4 sm:$0xff]  }
 0x184   :  { %2961 = vmatpush1.bf16.msra.mxu0 %v4524_v15  ;;  %2992 = vmatprep.mubr.bf16.mxu0 %v3492_v16  ;;  %v4614_v16 = vld [vmem:[%s6151_s3 + $0xe0] ss:$8 sps:$4 sm:$0xff]  }
 0x185   :  { %2962 = vmatprep.subr.bf16.mxu0 %v4529_v17  ;;  %3241 = vmatprep.subr.bf16.mxu1 %v4616_v14 }
 0x186   :  { %3242 = vmatpush1.bf16.msra.mxu1 %v4614_v16 }
 0x188   :  { %2963 = vmatpush1.bf16.msra.mxu0 %v4527_v18  ;;  %v4619_v18 = vld [vmem:[%s6151_s3 + $0xf4] ss:$8 sps:$4 sm:$0xff]  }
 0x189   :  { %2964 = vmatprep.subr.bf16.mxu0 %v4532_v19  ;;  %v4617_v19 = vld [vmem:[%s6151_s3 + $0xf0] ss:$8 sps:$4 sm:$0xff]   ;;  %3243 = vmatprep.subr.bf16.mxu1 %v4619_v18 }
 0x18a   :  { %3244 = vmatpush1.bf16.msra.mxu1 %v4617_v19 }
 0x18c   :  { %2965 = vmatpush1.bf16.msra.mxu0 %v4530_v20  ;;  %v4620_v20 = vld [vmem:[%s6152_s5 + $0x40] sm:$0xff]  }
 0x18d   :  { %2966 = vmatprep.subr.bf16.mxu0 %v4535_v21  ;;  %3926 = vmatprep.subr.bf16.mxu1 %v4620_v20  ;;  %v437_v21 = vlaneseq }
 0x18f   :  { %v3439_v14 = vand.u32 127, %v437_v21 }
 0x190   :  { %2967 = vmatpush1.bf16.msra.mxu0 %v4533_v22  ;;  %v438_v22 = vshrl.u32 %v437_v21, 7 }
 0x191   :  { %2968 = vmatprep.subr.bf16.mxu0 %v4538_v23  ;;  %vm3440_vm0 = vcmp.lt.s32.totalorder %v3439_v14, 10 }
 0x192   :  { %v439_v23 = vsub.s32 0, %v438_v22 }
 0x194   :  { %2969 = vmatpush1.bf16.msra.mxu0 %v4536_v26  ;;  %v435_v26 = vld [vmem:[%s6153_s2] sm:$0x3] }
 0x195   :  { %2970 = vmatprep.subr.bf16.mxu0 %v4541_v27  ;;  %v443_v27 = vsub.s32 1, %v438_v22 }
 0x197   :  { %v3050_v63 = vrot.slane %v3041_v61, %v443_v27 }
 0x198   :  { %2971 = vmatpush1.bf16.msra.mxu0 %v4539_v32  ;;  %v440_v32 = vrot.slane %v435_v26, %v439_v23 }
 0x199   :  { %2972 = vmatprep.subr.bf16.mxu0 %v4544_v33  ;;  %v444_v33 = vrot.slane %v435_v26, %v443_v27 }
 0x19c   :  { %2973 = vmatpush1.bf16.msra.mxu0 %v4542_v36 }
 0x19d   :  { %2974 = vmatprep.subr.bf16.mxu0 %v4547_v24 }
 0x1a0   :  { %2975 = vmatpush1.bf16.msra.mxu0 %v4545_v25 }
 0x1a1   :  { %2976 = vmatprep.subr.bf16.mxu0 %v4550_v38 }
 0x1a4   :  { %2977 = vmatpush1.bf16.msra.mxu0 %v4548_v31 }
 0x1a5   :  { %2978 = vmatprep.subr.bf16.mxu0 %v4553_v42 }
 0x1a8   :  { %2979 = vmatpush1.bf16.msra.mxu0 %v4551_v43 }
 0x1a9   :  { %2980 = vmatprep.subr.bf16.mxu0 %v4556_v46 }
 0x1ac   :  { %2981 = vmatpush1.bf16.msra.mxu0 %v4554_v47 }
 0x1ad   :  { %2982 = vmatprep.subr.bf16.mxu0 %v4559_v30  ;;  %v4621_v30 = vld [vmem:[%s6152_s5] sm:$0xff]  }
 0x1b0   :  { %2983 = vmatpush1.bf16.msra.mxu0 %v4557_v39  ;;  %v4622_v39 = vld [vmem:[%s6152_s5 + $0x48] sm:$0xff]  }
 0x1b1   :  { %2984 = vmatprep.subr.bf16.mxu0 %v4562_v50  ;;  %v4625_v50 = vld [vmem:[%s6152_s5 + $0x10] sm:$0xff]  }
 0x1b4   :  { %2985 = vmatpush1.bf16.msra.mxu0 %v4560_v52  ;;  %v4627_v52 = vld [vmem:[%s6152_s5 + $0x18] sm:$0xff]  }
 0x1b5   :  { %2986 = vmatprep.subr.bf16.mxu0 %v4565_v54  ;;  %v4629_v54 = vld [vmem:[%s6152_s5 + $0x20] sm:$0xff]  }
 0x1b8   :  { %2987 = vmatpush1.bf16.msra.mxu0 %v4563_v56  ;;  %v4631_v56 = vld [vmem:[%s6152_s5 + $0x28] sm:$0xff]  }
 0x1b9   :  { %2988 = vmatprep.subr.bf16.mxu0 %v4568_v58  ;;  %v4633_v58 = vld [vmem:[%s6152_s5 + $0x30] sm:$0xff]  }
 0x1bc   :  { %2989 = vmatpush1.bf16.msra.mxu0 %v4566_v60  ;;  %v4635_v60 = vld [vmem:[%s6152_s5 + $0x38] sm:$0xff]  }
 0x1bd   :  { %2990 = vmatprep.subr.bf16.mxu0 %v4571_v62  ;;  %v3046_v62 = vrot.slane %v3041_v61, %v439_v23 }
 0x1c0   :  { %2991 = vmatpush1.bf16.msra.mxu0 %v4569_v0 }
 0x1c3   :  { %2993 = vmatmul.mubr.bf16.vlgmr.msra.gmra.mrb[0].mxu0 %v3491_v2 }
 0x215   :  { %v2693_v12 = vpop.f32.mrb[0].mxu1 }
 0x216   :  { %v2695_v13 = vpop.f32.mrb[1].mxu1  ;;  %v3948_v36 = vadd.f32 %v2693_v12, %v440_v32 }
 0x217   :  { %v2697_v15 = vpop.f32.mrb[2].mxu1  ;;  %v3950_v24 = vadd.f32 %v2695_v13, %v444_v33 }
 0x218   :  { %v2699_v17 = vpop.f32.mrb[3].mxu1  ;;  %v3952_v29 = vadd.f32 %v2697_v15, %v440_v32 }
 0x219   :  { %v3954_v28 = vadd.f32 %v2699_v17, %v444_v33  ;;  %v3909_v17 = vld [vmem:[%s6155_s6] ss:$0 sm:$0xff] }
 0x296   :  { %v2994_v25 = vpop.f32.mrb[0].mxu0 }
 0x297   :  { %v3949_v37 = vadd.f32 %v3948_v36, %v2994_v25  ;;  %v2996_v38 = vpop.f32.mrb[1].mxu0 }
 0x298   :  { %v3951_v31 = vadd.f32 %v3950_v24, %v2996_v38  ;;  %v2998_v34 = vpop.f32.mrb[2].mxu0 }
 0x299   :  { %v3953_v35 = vadd.f32 %v3952_v29, %v2998_v34  ;;  %v3000_v42 = vpop.f32.mrb[3].mxu0  ;;  %v3003_v44 = vmax.f32 %v3949_v37, 0.0 }
 0x29a   :  { %v3955_v43 = vadd.f32 %v3954_v28, %v3000_v42  ;;  %v3004_v46 = vmax.f32 %v3951_v31, 0.0 }
 0x29b   :  { %v3005_v45 = vmax.f32 %v3953_v35, 0.0 }
 0x29c   :  { %v3006_v47 = vmax.f32 %v3955_v43, 0.0 }
 0x29d   :  { %v3007_v48 = vpack.c.bf16 %v3005_v45, %v3003_v44 }
 0x29e   :  { %v3008_v49 = vpack.c.bf16 %v3006_v47, %v3004_v46 }
 0x2a0   :  { %3245 = vmatprep.mubr.bf16.mxu1 %v3008_v49 }
 0x2a1   :  { %3246 = vmatmul.mubr.bf16.vlgmr.msra.gmra.mrb[4].mxu1 %v3007_v48 }
 0x2a2   :  { %3927 = vmatpush3.bf16.msra.mxu1 %v4621_v30 }
 0x2a3   :  { %3928 = vmatprep.subr.bf16.mxu1 %v4622_v39 }
 0x2a6   :  { %3929 = vmatpush3.bf16.msra.mxu1 %v4623_v40 }
 0x2a7   :  { %3930 = vmatprep.subr.bf16.mxu1 %v4624_v41 }
 0x2aa   :  { %3931 = vmatpush3.bf16.msra.mxu1 %v4625_v50 }
 0x2ab   :  { %3932 = vmatprep.subr.bf16.mxu1 %v4626_v51 }
 0x2ae   :  { %3933 = vmatpush3.bf16.msra.mxu1 %v4627_v52 }
 0x2af   :  { %3934 = vmatprep.subr.bf16.mxu1 %v4628_v53 }
 0x2b2   :  { %3935 = vmatpush3.bf16.msra.mxu1 %v4629_v54 }
 0x2b3   :  { %3936 = vmatprep.subr.bf16.mxu1 %v4630_v55 }
 0x2b6   :  { %3937 = vmatpush3.bf16.msra.mxu1 %v4631_v56 }
 0x2b7   :  { %3938 = vmatprep.subr.bf16.mxu1 %v4632_v57 }
 0x2ba   :  { %3939 = vmatpush3.bf16.msra.mxu1 %v4633_v58 }
 0x2bb   :  { %3940 = vmatprep.subr.bf16.mxu1 %v4634_v59 }
 0x2be   :  { %3941 = vmatpush3.bf16.msra.mxu1 %v4635_v60 }
 0x374   :  { %v3247_v0 = vpop.f32.mrb[4].mxu1 }
 0x375   :  { %v3248_v1 = vadd.f32 %v3247_v0, %v3046_v62  ;;  %v3249_v2 = vpop.f32.mrb[5].mxu1 }
 0x376   :  { %v3250_v3 = vadd.f32 %v3249_v2, %v3050_v63  ;;  %v3251_v4 = vpop.f32.mrb[6].mxu1 }
 0x377   :  { %v3252_v5 = vadd.f32 %v3251_v4, %v3046_v62  ;;  %v3253_v6 = vpop.f32.mrb[7].mxu1  ;;  %v3256_v8 = vmax.f32 %v3248_v1, 0.0 }
 0x378   :  { %v3254_v7 = vadd.f32 %v3253_v6, %v3050_v63  ;;  %v3257_v10 = vmax.f32 %v3250_v3, 0.0 }
 0x379   :  { %v3258_v9 = vmax.f32 %v3252_v5, 0.0 }
 0x37a   :  { %v3259_v11 = vmax.f32 %v3254_v7, 0.0 }
 0x37b   :  { %v3260_v12 = vpack.c.bf16 %v3258_v9, %v3256_v8 }
 0x37c   :  { %v3261_v13 = vpack.c.bf16 %v3259_v11, %v3257_v10 }
 0x37e   :  { %3429 = vmatprep.mubr.bf16.mxu1 %v3261_v13 }
 0x37f   :  { %3430 = vmatmul.mubr.bf16.vlgmr.msra.gmra.mrb[8].mxu1 %v3260_v12 }
 0x452   :  { %v3942_v15 = vpop.f32.mrb[8].mxu1 }
 0x453   :  { %v3943_v16 = vpop.f32.mrb[9].mxu1 }
 0x454   :  { %v3944_v18 = vadd.f32 %v3943_v16, %v3942_v15  ;;  %v3945_v19 = vpop.f32.mrb[10].mxu1 }
 0x455   :  { %v3946_v20 = vpop.f32.mrb[11].mxu1 }
 0x456   :  { %v3947_v22 = vadd.f32 %v3946_v20, %v3945_v19  ;;  %v3432_v23 = vadd.f32 %v3944_v18, %v3909_v17 }
 0x458   :  { %v3441_v26 = vsel %vm3440_vm0, %v3432_v23, -1e+30  ;;  %v3435_v27 = vadd.f32 %v3947_v22, %v3909_v17 }
 0x459   :  { %3443 = vmax.xlane.f32.xlu0 %v3441_v26 }
 0x45a   :  { %v3442_v32 = vsel %vm3440_vm0, %v3435_v27, -1e+30 }
 0x45d   :  { %3445 = vmax.xlane.f32.xlu0 %v3442_v32 }
 0x4e6   :  { %v3444_v33 = vpop.xlane.xlu0 %3443 }
 0x4e7   :  { %v3447_v36 = vsub.f32 %v3441_v26, %v3444_v33 }
 0x4e9   :  { %v3449_v21 = vmul.f32 1.442695, %v3447_v36 }
 0x4ea   :  { %v3446_v24 = vpop.xlane.xlu0 %3445 }
 0x4eb   :  { %v3448_v25 = vsub.f32 %v3442_v32, %v3446_v24  ;;  %4636 = vpow2.f32 %v3449_v21 }
 0x4ed   :  { %v3451_v29 = vmul.f32 1.442695, %v3448_v25 }
 0x4ef   :  { %4638 = vpow2.f32 %v3451_v29 }
 0x4f5   :  { %v4637_v37 = vpop.eup %4636 }
 0x4f6   :  { %3453 = vadd.xlane.f32.xlu1 %v4637_v37 }
 0x4f9   :  { %v4639_v38 = vpop.eup %4638 }
 0x4fa   :  { %3455 = vadd.xlane.f32.xlu1 %v4639_v38 }
 0x583   :  { %v3454_v28 = vpop.xlane.xlu1 %3453 }
 0x584   :  { %4640 = vlog2.f32 %v3454_v28 }
 0x587   :  { %v3456_v31 = vpop.xlane.xlu1 %3455 }
 0x588   :  { %4642 = vlog2.f32 %v3456_v31 }
 0x58e   :  { %v4641_v34 = vpop.eup %4640 }
 0x58f   :  { %v3458_v35 = vmul.f32 0.6931472, %v4641_v34 }
 0x591   :  { %v3461_v42 = vsub.f32 %v3447_v36, %v3458_v35 }
 0x592   :  { %v4643_v43 = vpop.eup %4642 }
 0x593   :  { %3463 = vst [vmem:[%s6156_s7] sm:$0xff] %v3461_v42  ;;  %v3460_v44 = vmul.f32 0.6931472, %v4643_v43 }
 0x595   :  { %v3462_v45 = vsub.f32 %v3448_v25, %v3460_v44 }
 0x597   :  { %3464 = vst [vmem:[%s6156_s7 + $0x8] sm:$0xff] %v3462_v45 }

</bundles_post_ra>
